<compile_context>
chip_gen: v7x
topology: tpu7x:2x2x1
jax: 0.10.0
libtpu: 0.0.40
codegen_flags: <defaults>
</compile_context>

<pallas_src>
import jax
import jax.numpy as jnp
from jax.experimental import pallas as pl
from jax.experimental.pallas import tpu as pltpu


# ----------------------------------------------------------------------------
# Kernel
# ----------------------------------------------------------------------------
def _swiglu_ffn_kernel(x_ref, w1_ref, b1_ref, w2_ref, b2_ref, w3_ref, b3_ref,
                       o_ref, acc_ref):
    """Grid = (token tiles [parallel], hidden tiles [arbitrary]).

    Per (i, k):   acc += (silu(x @ w1_k + b1_k) * (x @ w2_k + b2_k)) @ w3_k
    At k == last: o = x + acc + b3   (residual; out_dims == embed_dims).
    """
    k = pl.program_id(1)

    @pl.when(k == 0)
    def _():
        acc_ref[...] = jnp.zeros_like(acc_ref)

    x = x_ref[...]

    # MXU dots: native dtype operands, f32 accumulation.
    x1 = jnp.dot(x, w1_ref[...], preferred_element_type=jnp.float32)
    x1 = x1 + b1_ref[...].astype(jnp.float32)
    x2 = jnp.dot(x, w2_ref[...], preferred_element_type=jnp.float32)
    x2 = x2 + b2_ref[...].astype(jnp.float32)

    # SwiGLU gate in f32 (VPU + EUP), back to weight dtype for dot #2.
    hidden = (x1 * jax.nn.sigmoid(x1) * x2).astype(w3_ref.dtype)

    acc_ref[...] += jnp.dot(hidden, w3_ref[...],
                            preferred_element_type=jnp.float32)

    @pl.when(k == pl.num_programs(1) - 1)
    def _():
        out = acc_ref[...] + b3_ref[...].astype(jnp.float32)
        o_ref[...] = (x.astype(jnp.float32) + out).astype(o_ref.dtype)


# ----------------------------------------------------------------------------
# Helpers
# ----------------------------------------------------------------------------
def _round_up(n, m):
    return -(-n // m) * m


def _pad2(a, rows, cols):
    r, c = a.shape
    if r == rows and c == cols:
        return a
    return jnp.pad(a, ((0, rows - r), (0, cols - c)))


def _tpu_vmem_and_granule():
    """Best-effort hardware query with safe fallbacks."""
    vmem_cap = 64 << 20   # most conservative (v7x per-TensorCore VMEM)
    granule = 128         # exact on every generation
    try:
        info = pltpu.get_tpu_info()
        cap = getattr(info, "vmem_capacity_bytes", None)
        if cap:
            vmem_cap = int(cap)
        # v6e/v7x MXUs are 256x256: pad K/N to 256 there to avoid half passes.
        for name in ("mxu_size", "mxu_contracting_size", "mxu_column_count"):
            v = getattr(info, name, None)
            if v:
                granule = max(128, min(int(v), 256))
                break
    except Exception:
        pass
    return vmem_cap, granule


# ----------------------------------------------------------------------------
# Parameter preparation (hoist out of the per-call path: run at load time)
# ----------------------------------------------------------------------------
def prepare_swiglu_params(w12, b12, w3, b3, *, pad_granule=None):
    """Split the fused first projection and zero-pad weights once.

    w12: (D, 2H), b12: (2H,), w3: (H, D), b3: (D,)  (JAX convention,
    i.e. transposed vs. torch nn.Linear.weight).
    """
    if pad_granule is None:
        _, pad_granule = _tpu_vmem_and_granule()
    D, two_h = w12.shape
    H = two_h // 2
    assert w12.shape == (D, two_h)
    assert w3.shape == (H, D), "fused residual path needs out_dims == embed_dims"
    assert b12.shape == (two_h,) and b3.shape == (D,)

    Dp = _round_up(D, pad_granule)
    Hp = _round_up(H, pad_granule)

    w1, w2 = w12[:, :H], w12[:, H:]
    b1, b2 = b12[:H], b12[H:]

    return dict(
        D=D, H=H, Dp=Dp, Hp=Hp, granule=pad_granule,
        w1=_pad2(w1, Dp, Hp), w2=_pad2(w2, Dp, Hp), w3=_pad2(w3, Hp, Dp),
        b1=_pad2(b1.reshape(1, H), 1, Hp),
        b2=_pad2(b2.reshape(1, H), 1, Hp),
        b3=_pad2(b3.reshape(1, D), 1, Dp),
    )


# ----------------------------------------------------------------------------
# Forward
# ----------------------------------------------------------------------------
def swiglu_ffn_apply(x, params, *, tile_m=None, tile_h=None):
    """SwiGLU FFN forward using pre-split / pre-padded params.

    x: (B, N, D). Returns (B, N, D) in x.dtype.
    """
    B, N, D = x.shape
    assert D == params["D"], "x last dim must equal embed_dims"
    H, Dp, Hp, granule = params["H"], params["Dp"], params["Hp"], params["granule"]
    M = B * N

    vmem_cap, _ = _tpu_vmem_and_granule()
    usable = max(vmem_cap - (16 << 20), 24 << 20)   # leave Mosaic headroom

    x_bytes = jnp.dtype(x.dtype).itemsize
    w_bytes = jnp.dtype(params["w1"].dtype).itemsize
    b_bytes = jnp.dtype(params["b1"].dtype).itemsize
    slop = 4 << 20   # Mosaic internal scratch / vreg spill headroom

    def budget(tm, th, nbuf_w):
        weights = nbuf_w * (3 * Dp * th * w_bytes + 2 * th * b_bytes) + Dp * b_bytes
        io = 2 * 2 * tm * Dp * x_bytes      # double-buffered x & out tiles
        inter = 3 * tm * th * 4             # f32 x1, x2, gate live set
        acc = tm * Dp * 4                   # f32 accumulator scratch
        return weights + io + inter + acc + slop

    # ---- tile_m: 512 on 128-MiB chips, 256 on v7x; shrink for small M ------
    if tile_m is None:
        tile_m = 512 if vmem_cap >= (96 << 20) else 256
    while tile_m > 128 and -(-M // tile_m) < 2:
        tile_m //= 2
    assert tile_m % 8 == 0

    # ---- tile_h: weight-resident if it fits, else H-tiled streaming --------
    if tile_h is None:
        if budget(tile_m, Hp, 1) <= usable:
            tile_h = Hp
        else:
            th = Hp
            while th > granule and budget(tile_m, th, 2) > usable:
                th = max(granule, _round_up(th // 2, granule))
            tile_h = th
            while tile_m > 128 and budget(tile_m, tile_h, 2) > usable:
                tile_m //= 2
    tile_h = min(tile_h, Hp)
    assert tile_h % 128 == 0

    Hp_eff = _round_up(Hp, tile_h)
    resident = tile_h == Hp_eff

    # Re-pad along H only if the chosen tile does not divide the prepared pad.
    w1p, w2p, w3p = params["w1"], params["w2"], params["w3"]
    b1p, b2p, b3p = params["b1"], params["b2"], params["b3"]
    if Hp_eff != Hp:
        w1p = _pad2(w1p, Dp, Hp_eff)
        w2p = _pad2(w2p, Dp, Hp_eff)
        w3p = _pad2(w3p, Hp_eff, Dp)
        b1p = _pad2(b1p, 1, Hp_eff)
        b2p = _pad2(b2p, 1, Hp_eff)

    Mp = _round_up(max(M, 1), tile_m)
    x2d = _pad2(x.reshape(M, D), Mp, Dp)

    vmem_limit = int(min(max(budget(tile_m, tile_h, 1 if resident else 2),
                             32 << 20), usable))

    cost = pl.CostEstimate(
        flops=int(6 * Mp * Dp * Hp_eff),
        transcendentals=int(Mp * Hp_eff),
        bytes_accessed=int(2 * Mp * Dp * x_bytes
                           + 3 * Dp * Hp_eff * w_bytes
                           + (2 * Hp_eff + Dp) * b_bytes),
    )

    grid = (Mp // tile_m, Hp_eff // tile_h)

    def _make_spec(shape, index_map, nbuf):
        if nbuf is None:
            return pl.BlockSpec(shape, index_map)
        try:
            return pl.BlockSpec(shape, index_map, pipeline_mode=pl.Buffered(nbuf))
        except Exception:
            return pl.BlockSpec(shape, index_map)

    def _run(use_single_buffer):
        # Resident weights/biases are fetched once (constant index_map):
        # single-buffer them to halve weight VMEM. Streamed weights keep the
        # default double-buffering so the DMA stays hidden behind compute.
        nb_w = 1 if (resident and use_single_buffer) else None
        nb_b3 = 1 if use_single_buffer else None
        in_specs = [
            pl.BlockSpec((tile_m, Dp), lambda i, k: (i, 0)),        # x tile
            _make_spec((Dp, tile_h), lambda i, k: (0, k), nb_w),    # w1
            _make_spec((1, tile_h), lambda i, k: (0, k), nb_w),     # b1
            _make_spec((Dp, tile_h), lambda i, k: (0, k), nb_w),    # w2
            _make_spec((1, tile_h), lambda i, k: (0, k), nb_w),     # b2
            _make_spec((tile_h, Dp), lambda i, k: (k, 0), nb_w),    # w3
            _make_spec((1, Dp), lambda i, k: (0, 0), nb_b3),        # b3
        ]
        return pl.pallas_call(
            _swiglu_ffn_kernel,
            out_shape=jax.ShapeDtypeStruct((Mp, Dp), x.dtype),
            grid_spec=pltpu.PrefetchScalarGridSpec(
                num_scalar_prefetch=0,
                grid=grid,
                in_specs=in_specs,
                out_specs=pl.BlockSpec((tile_m, Dp), lambda i, k: (i, 0)),
                scratch_shapes=[pltpu.VMEM((tile_m, Dp), jnp.float32)],
            ),
            compiler_params=pltpu.CompilerParams(
                dimension_semantics=("parallel", "arbitrary"),
                vmem_limit_bytes=vmem_limit,
            ),
            cost_estimate=cost,
        )(x2d, w1p, b1p, w2p, b2p, w3p, b3p)

    try:
        out2d = _run(True)
    except Exception:
        # Fallback if single-buffering via pipeline_mode is rejected by this
        # jax/Mosaic version; semantics are identical, only VMEM use differs.
        out2d = _run(False)

    return out2d[:M, :D].reshape(B, N, D)


def swiglu_ffn(x, w12, b12, w3, b3, *, tile_m=None, tile_h=None):
    """Convenience wrapper (prefer prepare_swiglu_params once + apply per call)."""
    params = prepare_swiglu_params(w12, b12, w3, b3)
    return swiglu_ffn_apply(x, params, tile_m=tile_m, tile_h=tile_h)


def swiglu_ffn_reference(x, w12, b12, w3, b3):
    """Pure-JAX reference (f32 math)."""
    xf = x.astype(jnp.float32)
    x12 = xf @ w12.astype(jnp.float32) + b12.astype(jnp.float32)
    h = w12.shape[1] // 2
    x1, x2 = x12[..., :h], x12[..., h:]
    hidden = jax.nn.silu(x1) * x2
    out = hidden @ w3.astype(jnp.float32) + b3.astype(jnp.float32)
    return xf + out


if __name__ == "__main__":
    key = jax.random.PRNGKey(0)
    k1, k2, k3 = jax.random.split(key, 3)

    # --- Test 1: float32, aligned shapes, hoisted weight prep ---------------
    B, N, D, H = 2, 8, 128, 256
    kx, kw12, kb12, kw3, kb3 = jax.random.split(k1, 5)
    x = jax.random.normal(kx, (B, N, D), jnp.float32)
    w12 = jax.random.normal(kw12, (D, 2 * H), jnp.float32) * 0.05
    b12 = jax.random.normal(kb12, (2 * H,), jnp.float32) * 0.01
    w3 = jax.random.normal(kw3, (H, D), jnp.float32) * 0.05
    b3 = jax.random.normal(kb3, (D,), jnp.float32) * 0.01

    params = prepare_swiglu_params(w12, b12, w3, b3)   # done once at load time
    out = jax.block_until_ready(swiglu_ffn_apply(x, params))
    ref = swiglu_ffn_reference(x, w12, b12, w3, b3)
    assert out.shape == (B, N, D)
    assert jnp.allclose(out, ref, atol=2e-2, rtol=1e-2), "f32 mismatch vs reference"

    # --- Test 2: bfloat16, unaligned shapes (exercises padding path) --------
    B, N, D, H = 2, 9, 96, 80
    kx, kw12, kb12, kw3, kb3 = jax.random.split(k2, 5)
    x = jax.random.normal(kx, (B, N, D), jnp.float32).astype(jnp.bfloat16)
    w12 = (jax.random.normal(kw12, (D, 2 * H), jnp.float32) * 0.05).astype(jnp.bfloat16)
    b12 = (jax.random.normal(kb12, (2 * H,), jnp.float32) * 0.01).astype(jnp.bfloat16)
    w3 = (jax.random.normal(kw3, (H, D), jnp.float32) * 0.05).astype(jnp.bfloat16)
    b3 = (jax.random.normal(kb3, (D,), jnp.float32) * 0.01).astype(jnp.bfloat16)

    out_bf16 = jax.block_until_ready(swiglu_ffn(x, w12, b12, w3, b3))
    ref_bf16 = swiglu_ffn_reference(x, w12, b12, w3, b3)
    assert out_bf16.shape == (B, N, D)
    assert out_bf16.dtype == jnp.bfloat16
    assert jnp.allclose(out_bf16.astype(jnp.float32), ref_bf16,
                        atol=5e-2, rtol=5e-2), "bf16 mismatch vs reference"

    # --- Test 3: forced H-tiled accumulator path (multi-step reduction) -----
    B, N, D, H = 2, 8, 128, 512
    kx, kw12, kb12, kw3, kb3 = jax.random.split(k3, 5)
    x = jax.random.normal(kx, (B, N, D), jnp.float32)
    w12 = jax.random.normal(kw12, (D, 2 * H), jnp.float32) * 0.05
    b12 = jax.random.normal(kb12, (2 * H,), jnp.float32) * 0.01
    w3 = jax.random.normal(kw3, (H, D), jnp.float32) * 0.05
    b3 = jax.random.normal(kb3, (D,), jnp.float32) * 0.01

    out_t = jax.block_until_ready(
        swiglu_ffn(x, w12, b12, w3, b3, tile_m=128, tile_h=256))
    ref_t = swiglu_ffn_reference(x, w12, b12, w3, b3)
    assert out_t.shape == (B, N, D)
    assert jnp.allclose(out_t, ref_t, atol=2e-2, rtol=1e-2), "H-tiled mismatch vs reference"

    print("KERNEL_OK")
</pallas_src>

<mosaic_0001>
module attributes {stable_mosaic.version = 11 : i64} {
  func.func @_swiglu_ffn_kernel(%arg0: i32, %arg1: i32, %arg2: memref<128x128xf32, #tpu.memory_space<vmem>>, %arg3: memref<128x256xf32, #tpu.memory_space<vmem>>, %arg4: memref<1x256xf32, #tpu.memory_space<vmem>>, %arg5: memref<128x256xf32, #tpu.memory_space<vmem>>, %arg6: memref<1x256xf32, #tpu.memory_space<vmem>>, %arg7: memref<256x128xf32, #tpu.memory_space<vmem>>, %arg8: memref<1x128xf32, #tpu.memory_space<vmem>>, %arg9: memref<128x128xf32, #tpu.memory_space<vmem>>, %arg10: memref<128x128xf32, #tpu.memory_space<vmem>>) attributes {dimension_semantics = [#tpu.dimension_semantics<parallel>, #tpu.dimension_semantics<arbitrary>], iteration_bounds = array<i64: 1, 1>, scalar_prefetch = 0 : i64, scratch_operands = 1 : i64, tpu.core_type = #tpu.core_type<tc>, window_params = [{transform_indices = @transform_0, window_bounds = array<i64: 128, 128>}, {pipeline_mode = #tpu.pipeline_mode<synchronous>, transform_indices = @transform_1, window_bounds = array<i64: 128, 256>}, {pipeline_mode = #tpu.pipeline_mode<synchronous>, transform_indices = @transform_2, window_bounds = array<i64: 1, 256>}, {pipeline_mode = #tpu.pipeline_mode<synchronous>, transform_indices = @transform_3, window_bounds = array<i64: 128, 256>}, {pipeline_mode = #tpu.pipeline_mode<synchronous>, transform_indices = @transform_4, window_bounds = array<i64: 1, 256>}, {pipeline_mode = #tpu.pipeline_mode<synchronous>, transform_indices = @transform_5, window_bounds = array<i64: 256, 128>}, {pipeline_mode = #tpu.pipeline_mode<synchronous>, transform_indices = @transform_6, window_bounds = array<i64: 1, 128>}, {transform_indices = @transform_7, window_bounds = array<i64: 128, 128>}]} {
    %c0_i32 = arith.constant 0 : i32
    %0 = arith.cmpi eq, %arg1, %c0_i32 : i32
    %1 = arith.extui %0 : i1 to i32
    %c0_i32_0 = arith.constant 0 : i32
    %2 = arith.cmpi ne, %1, %c0_i32_0 : i32
    scf.if %2 {
      %cst_21 = arith.constant 0.000000e+00 : f32
      %29 = vector.broadcast %cst_21 : f32 to vector<128x128xf32>
      %c0_22 = arith.constant 0 : index
      %c0_23 = arith.constant 0 : index
      %30 = vector.load %arg10[%c0_22, %c0_23] : memref<128x128xf32, #tpu.memory_space<vmem>>, vector<128x128xf32>
      tpu.vector_store %arg10[%c0_22, %c0_23], %29 {strides = array<i32>} : memref<128x128xf32, #tpu.memory_space<vmem>>, vector<128x128xf32>,
    } else {
    }
    %c0 = arith.constant 0 : index
    %c0_1 = arith.constant 0 : index
    %3 = vector.load %arg2[%c0, %c0_1] : memref<128x128xf32, #tpu.memory_space<vmem>>, vector<128x128xf32>
    %c0_2 = arith.constant 0 : index
    %c0_3 = arith.constant 0 : index
    %4 = vector.load %arg3[%c0_2, %c0_3] : memref<128x256xf32, #tpu.memory_space<vmem>>, vector<128x256xf32>
    %cst = arith.constant dense<0.000000e+00> : vector<128x256xf32>
    %5 = tpu.matmul %3, %4, %cst {dimension_numbers = #tpu.dot_dimension_numbers<[1], [0], [0], [1], [0, 0, 1, 1], [], []>} : vector<128x128xf32>, vector<128x256xf32>, vector<128x256xf32> -> vector<128x256xf32>
    %c0_4 = arith.constant 0 : index
    %c0_5 = arith.constant 0 : index
    %6 = vector.load %arg4[%c0_4, %c0_5] : memref<1x256xf32, #tpu.memory_space<vmem>>, vector<1x256xf32>
    %7 = vector.broadcast %6 : vector<1x256xf32> to vector<128x256xf32>
    %8 = arith.addf %5, %7 : vector<128x256xf32>
    %c0_6 = arith.constant 0 : index
    %c0_7 = arith.constant 0 : index
    %9 = vector.load %arg5[%c0_6, %c0_7] : memref<128x256xf32, #tpu.memory_space<vmem>>, vector<128x256xf32>
    %cst_8 = arith.constant dense<0.000000e+00> : vector<128x256xf32>
    %10 = tpu.matmul %3, %9, %cst_8 {dimension_numbers = #tpu.dot_dimension_numbers<[1], [0], [0], [1], [0, 0, 1, 1], [], []>} : vector<128x128xf32>, vector<128x256xf32>, vector<128x256xf32> -> vector<128x256xf32>
    %c0_9 = arith.constant 0 : index
    %c0_10 = arith.constant 0 : index
    %11 = vector.load %arg6[%c0_9, %c0_10] : memref<1x256xf32, #tpu.memory_space<vmem>>, vector<1x256xf32>
    %12 = vector.broadcast %11 : vector<1x256xf32> to vector<128x256xf32>
    %13 = arith.addf %10, %12 : vector<128x256xf32>
    %14 = arith.negf %8 : vector<128x256xf32>
    %15 = math.exp %14 : vector<128x256xf32>
    %cst_11 = arith.constant 1.000000e+00 : f32
    %16 = vector.broadcast %cst_11 : f32 to vector<128x256xf32>
    %17 = arith.addf %16, %15 : vector<128x256xf32>
    %18 = arith.divf %16, %17 : vector<128x256xf32>
    %19 = arith.mulf %8, %18 : vector<128x256xf32>
    %20 = arith.mulf %19, %13 : vector<128x256xf32>
    %c0_12 = arith.constant 0 : index
    %c0_13 = arith.constant 0 : index
    %21 = vector.load %arg10[%c0_12, %c0_13] : memref<128x128xf32, #tpu.memory_space<vmem>>, vector<128x128xf32>
    %c0_14 = arith.constant 0 : index
    %c0_15 = arith.constant 0 : index
    %22 = vector.load %arg7[%c0_14, %c0_15] : memref<256x128xf32, #tpu.memory_space<vmem>>, vector<256x128xf32>
    %cst_16 = arith.constant dense<0.000000e+00> : vector<128x128xf32>
    %23 = tpu.matmul %20, %22, %cst_16 {dimension_numbers = #tpu.dot_dimension_numbers<[1], [0], [0], [1], [0, 0, 1, 1], [], []>} : vector<128x256xf32>, vector<256x128xf32>, vector<128x128xf32> -> vector<128x128xf32>
    %24 = arith.addf %21, %23 : vector<128x128xf32>
    %c0_17 = arith.constant 0 : index
    %c0_18 = arith.constant 0 : index
    %25 = vector.load %arg10[%c0_17, %c0_18] : memref<128x128xf32, #tpu.memory_space<vmem>>, vector<128x128xf32>
    tpu.vector_store %arg10[%c0_17, %c0_18], %24 {strides = array<i32>} : memref<128x128xf32, #tpu.memory_space<vmem>>, vector<128x128xf32>,
    %c0_i32_19 = arith.constant 0 : i32
    %26 = arith.cmpi eq, %arg1, %c0_i32_19 : i32
    %27 = arith.extui %26 : i1 to i32
    %c0_i32_20 = arith.constant 0 : i32
    %28 = arith.cmpi ne, %27, %c0_i32_20 : i32
    scf.if %28 {
      %c0_21 = arith.constant 0 : index
      %c0_22 = arith.constant 0 : index
      %29 = vector.load %arg10[%c0_21, %c0_22] : memref<128x128xf32, #tpu.memory_space<vmem>>, vector<128x128xf32>
      %c0_23 = arith.constant 0 : index
      %c0_24 = arith.constant 0 : index
      %30 = vector.load %arg8[%c0_23, %c0_24] : memref<1x128xf32, #tpu.memory_space<vmem>>, vector<1x128xf32>
      %31 = vector.broadcast %30 : vector<1x128xf32> to vector<128x128xf32>
      %32 = arith.addf %29, %31 : vector<128x128xf32>
      %33 = arith.addf %3, %32 : vector<128x128xf32>
      %c0_25 = arith.constant 0 : index
      %c0_26 = arith.constant 0 : index
      %34 = vector.load %arg9[%c0_25, %c0_26] : memref<128x128xf32, #tpu.memory_space<vmem>>, vector<128x128xf32>
      tpu.vector_store %arg9[%c0_25, %c0_26], %33 {strides = array<i32>} : memref<128x128xf32, #tpu.memory_space<vmem>>, vector<128x128xf32>,
    } else {
    }
    return
  }
  func.func @transform_0(%arg0: i32, %arg1: i32) -> (i32, i32) {
    %c0_i32 = arith.constant 0 : i32
    %c0_i32_0 = arith.constant 0 : i32
    return %arg0, %c0_i32 : i32, i32
  }
  func.func @transform_1(%arg0: i32, %arg1: i32) -> (i32, i32) {
    %c0_i32 = arith.constant 0 : i32
    %c0_i32_0 = arith.constant 0 : i32
    return %c0_i32, %arg1 : i32, i32
  }
  func.func @transform_2(%arg0: i32, %arg1: i32) -> (i32, i32) {
    %c0_i32 = arith.constant 0 : i32
    %c0_i32_0 = arith.constant 0 : i32
    return %c0_i32, %arg1 : i32, i32
  }
  func.func @transform_3(%arg0: i32, %arg1: i32) -> (i32, i32) {
    %c0_i32 = arith.constant 0 : i32
    %c0_i32_0 = arith.constant 0 : i32
    return %c0_i32, %arg1 : i32, i32
  }
  func.func @transform_4(%arg0: i32, %arg1: i32) -> (i32, i32) {
    %c0_i32 = arith.constant 0 : i32
    %c0_i32_0 = arith.constant 0 : i32
    return %c0_i32, %arg1 : i32, i32
  }
  func.func @transform_5(%arg0: i32, %arg1: i32) -> (i32, i32) {
    %c0_i32 = arith.constant 0 : i32
    %c0_i32_0 = arith.constant 0 : i32
    return %arg1, %c0_i32 : i32, i32
  }
  func.func @transform_6(%arg0: i32, %arg1: i32) -> (i32, i32) {
    %c0_i32 = arith.constant 0 : i32
    %c0_i32_0 = arith.constant 0 : i32
    %c0_i32_1 = arith.constant 0 : i32
    return %c0_i32, %c0_i32_0 : i32, i32
  }
  func.func @transform_7(%arg0: i32, %arg1: i32) -> (i32, i32) {
    %c0_i32 = arith.constant 0 : i32
    %c0_i32_0 = arith.constant 0 : i32
    return %arg0, %c0_i32 : i32, i32
  }
}

module attributes {stable_mosaic.version = 11 : i64} {
  func.func @_swiglu_ffn_kernel(%arg0: i32, %arg1: i32, %arg2: memref<128x128xf32, #tpu.memory_space<vmem>>, %arg3: memref<128x256xf32, #tpu.memory_space<vmem>>, %arg4: memref<1x256xf32, #tpu.memory_space<vmem>>, %arg5: memref<128x256xf32, #tpu.memory_space<vmem>>, %arg6: memref<1x256xf32, #tpu.memory_space<vmem>>, %arg7: memref<256x128xf32, #tpu.memory_space<vmem>>, %arg8: memref<1x128xf32, #tpu.memory_space<vmem>>, %arg9: memref<128x128xf32, #tpu.memory_space<vmem>>, %arg10: memref<128x128xf32, #tpu.memory_space<vmem>>) attributes {dimension_semantics = [#tpu.dimension_semantics<parallel>, #tpu.dimension_semantics<arbitrary>], iteration_bounds = array<i64: 1, 1>, scalar_prefetch = 0 : i64, scratch_operands = 1 : i64, tpu.core_type = #tpu.core_type<tc>, window_params = [{transform_indices = @transform_0, window_bounds = array<i64: 128, 128>}, {transform_indices = @transform_1, window_bounds = array<i64: 128, 256>}, {transform_indices = @transform_2, window_bounds = array<i64: 1, 256>}, {transform_indices = @transform_3, window_bounds = array<i64: 128, 256>}, {transform_indices = @transform_4, window_bounds = array<i64: 1, 256>}, {transform_indices = @transform_5, window_bounds = array<i64: 256, 128>}, {pipeline_mode = #tpu.pipeline_mode<synchronous>, transform_indices = @transform_6, window_bounds = array<i64: 1, 128>}, {transform_indices = @transform_7, window_bounds = array<i64: 128, 128>}]} {
    %c0_i32 = arith.constant 0 : i32
    %0 = arith.cmpi eq, %arg1, %c0_i32 : i32
    %1 = arith.extui %0 : i1 to i32
    %c0_i32_0 = arith.constant 0 : i32
    %2 = arith.cmpi ne, %1, %c0_i32_0 : i32
    scf.if %2 {
      %cst_21 = arith.constant 0.000000e+00 : f32
      %29 = vector.broadcast %cst_21 : f32 to vector<128x128xf32>
      %c0_22 = arith.constant 0 : index
      %c0_23 = arith.constant 0 : index
      %30 = vector.load %arg10[%c0_22, %c0_23] : memref<128x128xf32, #tpu.memory_space<vmem>>, vector<128x128xf32>
      tpu.vector_store %arg10[%c0_22, %c0_23], %29 {strides = array<i32>} : memref<128x128xf32, #tpu.memory_space<vmem>>, vector<128x128xf32>,
    } else {
    }
    %c0 = arith.constant 0 : index
    %c0_1 = arith.constant 0 : index
    %3 = vector.load %arg2[%c0, %c0_1] : memref<128x128xf32, #tpu.memory_space<vmem>>, vector<128x128xf32>
    %c0_2 = arith.constant 0 : index
    %c0_3 = arith.constant 0 : index
    %4 = vector.load %arg3[%c0_2, %c0_3] : memref<128x256xf32, #tpu.memory_space<vmem>>, vector<128x256xf32>
    %cst = arith.constant dense<0.000000e+00> : vector<128x256xf32>
    %5 = tpu.matmul %3, %4, %cst {dimension_numbers = #tpu.dot_dimension_numbers<[1], [0], [0], [1], [0, 0, 1, 1], [], []>} : vector<128x128xf32>, vector<128x256xf32>, vector<128x256xf32> -> vector<128x256xf32>
    %c0_4 = arith.constant 0 : index
    %c0_5 = arith.constant 0 : index
    %6 = vector.load %arg4[%c0_4, %c0_5] : memref<1x256xf32, #tpu.memory_space<vmem>>, vector<1x256xf32>
    %7 = vector.broadcast %6 : vector<1x256xf32> to vector<128x256xf32>
    %8 = arith.addf %5, %7 : vector<128x256xf32>
    %c0_6 = arith.constant 0 : index
    %c0_7 = arith.constant 0 : index
    %9 = vector.load %arg5[%c0_6, %c0_7] : memref<128x256xf32, #tpu.memory_space<vmem>>, vector<128x256xf32>
    %cst_8 = arith.constant dense<0.000000e+00> : vector<128x256xf32>
    %10 = tpu.matmul %3, %9, %cst_8 {dimension_numbers = #tpu.dot_dimension_numbers<[1], [0], [0], [1], [0, 0, 1, 1], [], []>} : vector<128x128xf32>, vector<128x256xf32>, vector<128x256xf32> -> vector<128x256xf32>
    %c0_9 = arith.constant 0 : index
    %c0_10 = arith.constant 0 : index
    %11 = vector.load %arg6[%c0_9, %c0_10] : memref<1x256xf32, #tpu.memory_space<vmem>>, vector<1x256xf32>
    %12 = vector.broadcast %11 : vector<1x256xf32> to vector<128x256xf32>
    %13 = arith.addf %10, %12 : vector<128x256xf32>
    %14 = arith.negf %8 : vector<128x256xf32>
    %15 = math.exp %14 : vector<128x256xf32>
    %cst_11 = arith.constant 1.000000e+00 : f32
    %16 = vector.broadcast %cst_11 : f32 to vector<128x256xf32>
    %17 = arith.addf %16, %15 : vector<128x256xf32>
    %18 = arith.divf %16, %17 : vector<128x256xf32>
    %19 = arith.mulf %8, %18 : vector<128x256xf32>
    %20 = arith.mulf %19, %13 : vector<128x256xf32>
    %c0_12 = arith.constant 0 : index
    %c0_13 = arith.constant 0 : index
    %21 = vector.load %arg10[%c0_12, %c0_13] : memref<128x128xf32, #tpu.memory_space<vmem>>, vector<128x128xf32>
    %c0_14 = arith.constant 0 : index
    %c0_15 = arith.constant 0 : index
    %22 = vector.load %arg7[%c0_14, %c0_15] : memref<256x128xf32, #tpu.memory_space<vmem>>, vector<256x128xf32>
    %cst_16 = arith.constant dense<0.000000e+00> : vector<128x128xf32>
    %23 = tpu.matmul %20, %22, %cst_16 {dimension_numbers = #tpu.dot_dimension_numbers<[1], [0], [0], [1], [0, 0, 1, 1], [], []>} : vector<128x256xf32>, vector<256x128xf32>, vector<128x128xf32> -> vector<128x128xf32>
    %24 = arith.addf %21, %23 : vector<128x128xf32>
    %c0_17 = arith.constant 0 : index
    %c0_18 = arith.constant 0 : index
    %25 = vector.load %arg10[%c0_17, %c0_18] : memref<128x128xf32, #tpu.memory_space<vmem>>, vector<128x128xf32>
    tpu.vector_store %arg10[%c0_17, %c0_18], %24 {strides = array<i32>} : memref<128x128xf32, #tpu.memory_space<vmem>>, vector<128x128xf32>,
    %c0_i32_19 = arith.constant 0 : i32
    %26 = arith.cmpi eq, %arg1, %c0_i32_19 : i32
    %27 = arith.extui %26 : i1 to i32
    %c0_i32_20 = arith.constant 0 : i32
    %28 = arith.cmpi ne, %27, %c0_i32_20 : i32
    scf.if %28 {
      %c0_21 = arith.constant 0 : index
      %c0_22 = arith.constant 0 : index
      %29 = vector.load %arg10[%c0_21, %c0_22] : memref<128x128xf32, #tpu.memory_space<vmem>>, vector<128x128xf32>
      %c0_23 = arith.constant 0 : index
      %c0_24 = arith.constant 0 : index
      %30 = vector.load %arg8[%c0_23, %c0_24] : memref<1x128xf32, #tpu.memory_space<vmem>>, vector<1x128xf32>
      %31 = vector.broadcast %30 : vector<1x128xf32> to vector<128x128xf32>
      %32 = arith.addf %29, %31 : vector<128x128xf32>
      %33 = arith.addf %3, %32 : vector<128x128xf32>
      %c0_25 = arith.constant 0 : index
      %c0_26 = arith.constant 0 : index
      %34 = vector.load %arg9[%c0_25, %c0_26] : memref<128x128xf32, #tpu.memory_space<vmem>>, vector<128x128xf32>
      tpu.vector_store %arg9[%c0_25, %c0_26], %33 {strides = array<i32>} : memref<128x128xf32, #tpu.memory_space<vmem>>, vector<128x128xf32>,
    } else {
    }
    return
  }
  func.func @transform_0(%arg0: i32, %arg1: i32) -> (i32, i32) {
    %c0_i32 = arith.constant 0 : i32
    %c0_i32_0 = arith.constant 0 : i32
    return %arg0, %c0_i32 : i32, i32
  }
  func.func @transform_1(%arg0: i32, %arg1: i32) -> (i32, i32) {
    %c0_i32 = arith.constant 0 : i32
    %c0_i32_0 = arith.constant 0 : i32
    return %c0_i32, %arg1 : i32, i32
  }
  func.func @transform_2(%arg0: i32, %arg1: i32) -> (i32, i32) {
    %c0_i32 = arith.constant 0 : i32
    %c0_i32_0 = arith.constant 0 : i32
    return %c0_i32, %arg1 : i32, i32
  }
  func.func @transform_3(%arg0: i32, %arg1: i32) -> (i32, i32) {
    %c0_i32 = arith.constant 0 : i32
    %c0_i32_0 = arith.constant 0 : i32
    return %c0_i32, %arg1 : i32, i32
  }
  func.func @transform_4(%arg0: i32, %arg1: i32) -> (i32, i32) {
    %c0_i32 = arith.constant 0 : i32
    %c0_i32_0 = arith.constant 0 : i32
    return %c0_i32, %arg1 : i32, i32
  }
  func.func @transform_5(%arg0: i32, %arg1: i32) -> (i32, i32) {
    %c0_i32 = arith.constant 0 : i32
    %c0_i32_0 = arith.constant 0 : i32
    return %arg1, %c0_i32 : i32, i32
  }
  func.func @transform_6(%arg0: i32, %arg1: i32) -> (i32, i32) {
    %c0_i32 = arith.constant 0 : i32
    %c0_i32_0 = arith.constant 0 : i32
    %c0_i32_1 = arith.constant 0 : i32
    return %c0_i32, %c0_i32_0 : i32, i32
  }
  func.func @transform_7(%arg0: i32, %arg1: i32) -> (i32, i32) {
    %c0_i32 = arith.constant 0 : i32
    %c0_i32_0 = arith.constant 0 : i32
    return %arg0, %c0_i32 : i32, i32
  }
}

</mosaic_0001>

<bundles_post_ra>
// kernel: tpu_custom_call.1
= control target key start
LH: loop header
LB: loop body
LE: loop exit
PB: predicated region body
PF: predicated region fallthrough
CT: control target
= control target key end

     0   :  { %12 = vsyncpa [#allocation4], 0  ;;  %s2101_s0 = inlined_call_operand.hbm [shape: f32[128,128], index: 0, kind: input, shape index: {}]   ;;  %s2102_s1 = inlined_call_operand.hbm [shape: f32[128,256], index: 1, kind: input, shape index: {}]   ;;  %s2103_s2 = inlined_call_operand.vmem [shape: f32[1,256], index: 2, kind: input, shape index: {}]   ;;  %s2104_s3 = inlined_call_operand.hbm [shape: f32[128,256], index: 3, kind: input, shape index: {}]   ;;  %s2105_s4 = inlined_call_operand.vmem [shape: f32[1,256], index: 4, kind: input, shape index: {}]   ;;  %s2106_s5 = inlined_call_operand.hbm [shape: f32[256,128], index: 5, kind: input, shape index: {}]   ;;  %s2107_s6 = inlined_call_operand.vmem [shape: f32[1,128], index: 6, kind: input, shape index: {}]   ;;  %s2108_s7 = inlined_call_operand.hbm [shape: f32[128,128], index: 7, kind: output, shape index: {}]  }
   0x1   :  { %13 = vsyncpa [#allocation7], 0 }
   0x2   :  { %14 = vsyncpa [#allocation10], 0 }
   0x3   :  { %15 = vsyncpa [#allocation5], 0  ;;  %s1599_s24 = smov [#allocation6]   ;;  %s1481_s28 = scalar_lea.hbm %s2102_s1, 4096 }
   0x4   :  { %s33_s25 = sshll.u32 %s1599_s24, 4  ;;  %p1482_p0 = scmp.ne.s32.totalorder %s2102_s1, %s1481_s28  ;;  %s34_s25 = int_to_ptr.vmem [resolvable:$true] %s33_s25 }
   0x5   :  { %p1485_p1 = scmp.lt.u32.totalorder %s1481_s28, %s2102_s1 }
   0x7   :  { %p1487_p2 = pnand %p1485_p1, %p1482_p0 }
   0x9   :  { %1490 = shalt.err (!%p1487_p2)
}
   0xa   :  { %s1491_s10 = scalar_lea.vmem %s34_s25, 4096  ;;  %p1496_p4 = scmp.lt.s32.totalorder %s34_s25, %s34_s25 }
   0xb   :  { %p1492_p3 = scmp.ne.s32.totalorder %s34_s25, %s1491_s10  ;;  %p1497_p5 = scmp.lt.s32.totalorder %s1491_s10, %s1491_s10 }
   0xd   :  { %p1498_p6 = por %p1497_p5, %p1496_p4 }
   0xf   :  { %p1499_p7 = pnand %p1498_p6, %p1492_p3 }
  0x11   :  { %1502 = shalt.err (!%p1499_p7)
}
  0x12   :  { %s1600_s11 = smov 256   ;;  %s1601_s12 = smov 16  }
  0x13   :  { %39 = dma.hbm_to_vmem [thread:$0]  %s2102_s1, 4096, %s34_s25, [#allocation7], %s1600_s11, %s1600_s11, %s1601_s12  }
  0x14   :  { %s1602_s15 = smov [#allocation3]   ;;  %s1503_s19 = scalar_lea.hbm %s2101_s0, 2048 }
  0x15   :  { %s21_s16 = sshll.u32 %s1602_s15, 4  ;;  %p1504_p8 = scmp.ne.s32.totalorder %s2101_s0, %s1503_s19  ;;  %s22_s16 = int_to_ptr.vmem [resolvable:$true] %s21_s16 }
  0x16   :  { %p1507_p9 = scmp.lt.u32.totalorder %s1503_s19, %s2101_s0 }
  0x18   :  { %p1509_p10 = pnand %p1507_p9, %p1504_p8 }
  0x1a   :  { %1512 = shalt.err (!%p1509_p10)
}
  0x1b   :  { %s1513_s24 = scalar_lea.vmem %s22_s16, 2048  ;;  %p1518_p12 = scmp.lt.s32.totalorder %s22_s16, %s22_s16 }
  0x1c   :  { %p1514_p11 = scmp.ne.s32.totalorder %s22_s16, %s1513_s24  ;;  %p1519_p13 = scmp.lt.s32.totalorder %s1513_s24, %s1513_s24 }
  0x1e   :  { %p1520_p0 = por %p1519_p13, %p1518_p12 }
  0x20   :  { %p1521_p1 = pnand %p1520_p0, %p1514_p11 }
  0x22   :  { %1524 = shalt.err (!%p1521_p1)
}
  0x23   :  { %s1603_s1 = smov 128   ;;  %s1604_s25 = smov 8  }
  0x24   :  { %27 = dma.hbm_to_vmem [thread:$0]  %s2101_s0, 2048, %s22_s16, [#allocation4], %s1603_s1, %s1603_s1, %s1604_s25  }
  0x25   :  { %s1605_s28 = smov [#allocation8]   ;;  %s1606_s30 = smov [#allocation9]  }
  0x26   :  { %s47_s29 = sshll.u32 %s1605_s28, 4  ;;  %s61_s8 = sshll.u32 %s1606_s30, 4  ;;  %s48_s29 = int_to_ptr.vmem [resolvable:$true] %s47_s29  ;;  %s1679_s8 = int_to_ptr.vmem [resolvable:$true] %s61_s8 }
  0x27   :  { %s1525_s13 = scalar_lea.hbm %s2104_s3, 4096 }
  0x28   :  { %p1526_p2 = scmp.ne.s32.totalorder %s2104_s3, %s1525_s13  ;;  %p1529_p3 = scmp.lt.u32.totalorder %s1525_s13, %s2104_s3 }
  0x2a   :  { %p1531_p4 = pnand %p1529_p3, %p1526_p2 }
  0x2c   :  { %1534 = shalt.err (!%p1531_p4)
}
  0x2d   :  { %s1535_s0 = scalar_lea.vmem %s48_s29, 4096  ;;  %p1540_p6 = scmp.lt.s32.totalorder %s48_s29, %s48_s29 }
  0x2e   :  { %p1536_p5 = scmp.ne.s32.totalorder %s48_s29, %s1535_s0  ;;  %p1541_p7 = scmp.lt.s32.totalorder %s1535_s0, %s1535_s0 }
  0x30   :  { %p1542_p8 = por %p1541_p7, %p1540_p6 }
  0x32   :  { %p1543_p9 = pnand %p1542_p8, %p1536_p5 }
  0x34   :  { %1546 = shalt.err (!%p1543_p9)
}
  0x35   :  { %53 = dma.hbm_to_vmem [thread:$0]  %s2104_s3, 4096, %s48_s29, [#allocation7], %s1600_s11, %s1600_s11, %s1601_s12  }
  0x36   :  { %s1547_s22 = scalar_lea.hbm %s2106_s5, 4096 }
  0x37   :  { %p1548_p10 = scmp.ne.s32.totalorder %s2106_s5, %s1547_s22  ;;  %p1551_p11 = scmp.lt.u32.totalorder %s1547_s22, %s2106_s5 }
  0x39   :  { %p1553_p12 = pnand %p1551_p11, %p1548_p10 }
  0x3b   :  { %1556 = shalt.err (!%p1553_p12)
}
  0x3c   :  { %s1557_s28 = scalar_lea.vmem %s1679_s8, 4096  ;;  %p1562_p0 = scmp.lt.s32.totalorder %s1679_s8, %s1679_s8 }
  0x3d   :  { %p1558_p13 = scmp.ne.s32.totalorder %s1679_s8, %s1557_s28  ;;  %p1563_p1 = scmp.lt.s32.totalorder %s1557_s28, %s1557_s28 }
  0x3f   :  { %p1564_p2 = por %p1563_p1, %p1562_p0 }
  0x41   :  { %p1565_p3 = pnand %p1564_p2, %p1558_p13 }
  0x43   :  { %1568 = shalt.err (!%p1565_p3)
}
  0x44   :  { %67 = dma.hbm_to_vmem [thread:$0]  %s2106_s5, 4096, %s1679_s8, [#allocation10], %s1603_s1, %s1603_s1, %s1604_s25  }
  0x45   :  { %1591 = dma.done.wait [#allocation4], 2048  }
  0x46   :  { %1592 = vsyncadd [#allocation4], 4294965248 }
  0x47   :  { %1593 = dma.done.wait [#allocation7], 8192  }
  0x48   :  { %1594 = vsyncadd [#allocation7], 4294959104 }
  0x49   :  { %1595 = dma.done.wait [#allocation10], 4096  }
  0x4a   :  { %1596 = vsyncadd [#allocation10], 4294963200  ;;  %v1607_v0 = vmov 0.0   ;;  %v119_v1 = vld [vmem:[#allocation6 + $0x8] sm:$0xff]  ;;  %v121_v2 = vld [vmem:[#allocation6 + $0x18] sm:$0xff] }
  0x4b   :  { %226 = vmatprep.mubr.f32.mxu0 %v1607_v0  ;;  %274 = vmatprep.mubr.f32.mxu1 %v1607_v0  ;;  %v118_v3 = vld [vmem:[#allocation6] sm:$0xff]  ;;  %v1215_v4 = vpack.c.bf16 %v121_v2, %v119_v1  ;;  %v120_v5 = vld [vmem:[#allocation6 + $0x10] sm:$0xff]  ;;  %v123_v6 = vld [vmem:[#allocation6 + $0x28] sm:$0xff] }
  0x4c   :  { %v125_v7 = vld [vmem:[#allocation6 + $0x38] sm:$0xff]  ;;  %v1217_v8 = vpack.c.bf16 %v120_v5, %v118_v3  ;;  %v122_v10 = vld [vmem:[#allocation6 + $0x20] sm:$0xff]  ;;  %v124_v11 = vld [vmem:[#allocation6 + $0x30] sm:$0xff] }
  0x4d   :  { %v1219_v9 = vpack.c.bf16 %v125_v7, %v123_v6  ;;  %v127_v12 = vld [vmem:[#allocation6 + $0x48] sm:$0xff]  ;;  %1216 = vmatprep.subr.bf16.mxu0 %v1215_v4  ;;  %1311 = vmatprep.subr.bf16.mxu1 %v1215_v4  ;;  %v129_v13 = vld [vmem:[#allocation6 + $0x58] sm:$0xff]  ;;  %v1221_v14 = vpack.c.bf16 %v124_v11, %v122_v10  ;;  %v126_v16 = vld [vmem:[#allocation6 + $0x40] sm:$0xff] }
  0x4e   :  { %1218 = vmatpush1.bf16.msra.mxu0 %v1217_v8  ;;  %1319 = vmatpush1.bf16.msra.mxu1 %v1217_v8  ;;  %v1223_v15 = vpack.c.bf16 %v129_v13, %v127_v12  ;;  %v128_v17 = vld [vmem:[#allocation6 + $0x50] sm:$0xff]  ;;  %v131_v18 = vld [vmem:[#allocation6 + $0x68] sm:$0xff]  ;;  %v133_v19 = vld [vmem:[#allocation6 + $0x78] sm:$0xff] }
  0x4f   :  { %1220 = vmatprep.subr.bf16.mxu0 %v1219_v9  ;;  %1312 = vmatprep.subr.bf16.mxu1 %v1219_v9  ;;  %v1225_v20 = vpack.c.bf16 %v128_v17, %v126_v16  ;;  %v1227_v21 = vpack.c.bf16 %v133_v19, %v131_v18  ;;  %v130_v22 = vld [vmem:[#allocation6 + $0x60] sm:$0xff]  ;;  %v132_v23 = vld [vmem:[#allocation6 + $0x70] sm:$0xff]  ;;  %v135_v24 = vld [vmem:[#allocation6 + $0x88] sm:$0xff] }
  0x50   :  { %v137_v25 = vld [vmem:[#allocation6 + $0x98] sm:$0xff]  ;;  %v1229_v26 = vpack.c.bf16 %v132_v23, %v130_v22  ;;  %v134_v28 = vld [vmem:[#allocation6 + $0x80] sm:$0xff]  ;;  %v136_v29 = vld [vmem:[#allocation6 + $0x90] sm:$0xff] }
  0x51   :  { %v1231_v27 = vpack.c.bf16 %v137_v25, %v135_v24  ;;  %v139_v30 = vld [vmem:[#allocation6 + $0xa8] sm:$0xff]  ;;  %v141_v31 = vld [vmem:[#allocation6 + $0xb8] sm:$0xff]  ;;  %v1233_v32 = vpack.c.bf16 %v136_v29, %v134_v28  ;;  %v138_v34 = vld [vmem:[#allocation6 + $0xa0] sm:$0xff] }
  0x52   :  { %1222 = vmatpush1.bf16.msra.mxu0 %v1221_v14  ;;  %1320 = vmatpush1.bf16.msra.mxu1 %v1221_v14  ;;  %v1235_v33 = vpack.c.bf16 %v141_v31, %v139_v30  ;;  %v140_v35 = vld [vmem:[#allocation6 + $0xb0] sm:$0xff]  ;;  %v143_v36 = vld [vmem:[#allocation6 + $0xc8] sm:$0xff]  ;;  %v145_v37 = vld [vmem:[#allocation6 + $0xd8] sm:$0xff] }
  0x53   :  { %1224 = vmatprep.subr.bf16.mxu0 %v1223_v15  ;;  %1313 = vmatprep.subr.bf16.mxu1 %v1223_v15  ;;  %v1237_v38 = vpack.c.bf16 %v140_v35, %v138_v34  ;;  %v1239_v39 = vpack.c.bf16 %v145_v37, %v143_v36  ;;  %v142_v40 = vld [vmem:[#allocation6 + $0xc0] sm:$0xff]  ;;  %v144_v41 = vld [vmem:[#allocation6 + $0xd0] sm:$0xff]  ;;  %v147_v42 = vld [vmem:[#allocation6 + $0xe8] sm:$0xff] }
  0x54   :  { %v149_v43 = vld [vmem:[#allocation6 + $0xf8] sm:$0xff]  ;;  %v1241_v44 = vpack.c.bf16 %v144_v41, %v142_v40  ;;  %v146_v46 = vld [vmem:[#allocation6 + $0xe0] sm:$0xff]  ;;  %v148_v47 = vld [vmem:[#allocation6 + $0xf0] sm:$0xff] }
  0x55   :  { %v1243_v45 = vpack.c.bf16 %v149_v43, %v147_v42  ;;  %v324_v48 = vld [vmem:[#allocation8 + $0x8] sm:$0xff]  ;;  %v326_v49 = vld [vmem:[#allocation8 + $0x18] sm:$0xff]  ;;  %v1245_v50 = vpack.c.bf16 %v148_v47, %v146_v46  ;;  %v323_v52 = vld [vmem:[#allocation8] sm:$0xff] }
  0x56   :  { %1226 = vmatpush1.bf16.msra.mxu0 %v1225_v20  ;;  %1321 = vmatpush1.bf16.msra.mxu1 %v1225_v20  ;;  %v1247_v51 = vpack.c.bf16 %v326_v49, %v324_v48  ;;  %v325_v53 = vld [vmem:[#allocation8 + $0x10] sm:$0xff]  ;;  %v328_v54 = vld [vmem:[#allocation8 + $0x28] sm:$0xff]  ;;  %v330_v55 = vld [vmem:[#allocation8 + $0x38] sm:$0xff] }
  0x57   :  { %1228 = vmatprep.subr.bf16.mxu0 %v1227_v21  ;;  %1314 = vmatprep.subr.bf16.mxu1 %v1227_v21  ;;  %v1718_v56 = vld [vmem:[#allocation3] sm:$0xff]  ;;  %v1249_v58 = vpack.c.bf16 %v325_v53, %v323_v52  ;;  %v1251_v59 = vpack.c.bf16 %v330_v55, %v328_v54  ;;  %v329_v61 = vld [vmem:[#allocation8 + $0x30] sm:$0xff]  ;;  %v332_v62 = vld [vmem:[#allocation8 + $0x48] sm:$0xff] }
  0x58   :  { %v1720_v57 = vld [vmem:[#allocation3 + $0x40] sm:$0xff]  ;;  %v334_v63 = vld [vmem:[#allocation8 + $0x58] sm:$0xff]  ;;  %v1725_v1 = vld [vmem:[#allocation3 + $0x8] sm:$0xff] }
  0x59   :  { %v327_v60 = vld [vmem:[#allocation8 + $0x20] sm:$0xff]  ;;  %v1727_v2 = vld [vmem:[#allocation3 + $0x48] sm:$0xff]  ;;  %v1255_v4 = vpack.c.bf16 %v334_v63, %v332_v62  ;;  %v333_v6 = vld [vmem:[#allocation8 + $0x50] sm:$0xff] }
  0x5a   :  { %1230 = vmatpush1.bf16.msra.mxu0 %v1229_v26  ;;  %1322 = vmatpush1.bf16.msra.mxu1 %v1229_v26  ;;  %v1253_v3 = vpack.c.bf16 %v329_v61, %v327_v60  ;;  %v331_v5 = vld [vmem:[#allocation8 + $0x40] sm:$0xff]  ;;  %v336_v7 = vld [vmem:[#allocation8 + $0x68] sm:$0xff]  ;;  %v338_v8 = vld [vmem:[#allocation8 + $0x78] sm:$0xff] }
  0x5b   :  { %1232 = vmatprep.subr.bf16.mxu0 %v1231_v27  ;;  %1315 = vmatprep.subr.bf16.mxu1 %v1231_v27  ;;  %v1733_v9 = vld [vmem:[#allocation3 + $0x10] sm:$0xff]  ;;  %v1257_v11 = vpack.c.bf16 %v333_v6, %v331_v5  ;;  %v1259_v12 = vpack.c.bf16 %v338_v8, %v336_v7  ;;  %v335_v13 = vld [vmem:[#allocation8 + $0x60] sm:$0xff]  ;;  %v340_v15 = vld [vmem:[#allocation8 + $0x88] sm:$0xff] }
  0x5c   :  { %v1735_v10 = vld [vmem:[#allocation3 + $0x50] sm:$0xff]  ;;  %v342_v16 = vld [vmem:[#allocation8 + $0x98] sm:$0xff]  ;;  %v339_v21 = vld [vmem:[#allocation8 + $0x80] sm:$0xff] }
  0x5d   :  { %v337_v14 = vld [vmem:[#allocation8 + $0x70] sm:$0xff]  ;;  %v1741_v17 = vld [vmem:[#allocation3 + $0x18] sm:$0xff]  ;;  %v1263_v20 = vpack.c.bf16 %v342_v16, %v340_v15  ;;  %v344_v23 = vld [vmem:[#allocation8 + $0xa8] sm:$0xff] }
  0x5e   :  { %1234 = vmatpush1.bf16.msra.mxu0 %v1233_v32  ;;  %1323 = vmatpush1.bf16.msra.mxu1 %v1233_v32  ;;  %v1743_v18 = vld [vmem:[#allocation3 + $0x58] sm:$0xff]  ;;  %v1261_v19 = vpack.c.bf16 %v337_v14, %v335_v13  ;;  %v341_v22 = vld [vmem:[#allocation8 + $0x90] sm:$0xff]  ;;  %v106_v25 = vld [vmem:[#allocation3 + $0x20] sm:$0xff] }
  0x5f   :  { %1236 = vmatprep.subr.bf16.mxu0 %v1235_v33  ;;  %1316 = vmatprep.subr.bf16.mxu1 %v1235_v33  ;;  %v346_v24 = vld [vmem:[#allocation8 + $0xb8] sm:$0xff]  ;;  %v1749_v26 = vld [vmem:[#allocation3 + $0x60] sm:$0xff]  ;;  %v1265_v27 = vpack.c.bf16 %v341_v22, %v339_v21  ;;  %v345_v30 = vld [vmem:[#allocation8 + $0xb0] sm:$0xff] }
  0x60   :  { %v1267_v28 = vpack.c.bf16 %v346_v24, %v344_v23  ;;  %v343_v29 = vld [vmem:[#allocation8 + $0xa0] sm:$0xff]  ;;  %v348_v31 = vld [vmem:[#allocation8 + $0xc8] sm:$0xff]  ;;  %v350_v32 = vld [vmem:[#allocation8 + $0xd8] sm:$0xff] }
  0x61   :  { %v107_v33 = vld [vmem:[#allocation3 + $0x28] sm:$0xff]  ;;  %v1269_v35 = vpack.c.bf16 %v345_v30, %v343_v29  ;;  %v1271_v36 = vpack.c.bf16 %v350_v32, %v348_v31  ;;  %v347_v37 = vld [vmem:[#allocation8 + $0xc0] sm:$0xff]  ;;  %v354_v40 = vld [vmem:[#allocation8 + $0xf8] sm:$0xff] }
  0x62   :  { %1238 = vmatpush1.bf16.msra.mxu0 %v1237_v38  ;;  %1324 = vmatpush1.bf16.msra.mxu1 %v1237_v38  ;;  %v115_v34 = vld [vmem:[#allocation3 + $0x68] sm:$0xff]  ;;  %v349_v38 = vld [vmem:[#allocation8 + $0xd0] sm:$0xff]  ;;  %v109_v47 = vld [vmem:[#allocation3 + $0x38] sm:$0xff] }
  0x63   :  { %1240 = vmatprep.subr.bf16.mxu0 %v1239_v39  ;;  %1317 = vmatprep.subr.bf16.mxu1 %v1239_v39  ;;  %v352_v39 = vld [vmem:[#allocation8 + $0xe8] sm:$0xff]  ;;  %v108_v41 = vld [vmem:[#allocation3 + $0x30] sm:$0xff]  ;;  %v1273_v43 = vpack.c.bf16 %v349_v38, %v347_v37  ;;  %v117_v48 = vld [vmem:[#allocation3 + $0x78] sm:$0xff] }
  0x64   :  { %v116_v42 = vld [vmem:[#allocation3 + $0x70] sm:$0xff]  ;;  %v800_v53 = vld [vmem:[#allocation9] sm:$0xff]  ;;  %v801_v54 = vld [vmem:[#allocation9 + $0x8] sm:$0xff] }
  0x65   :  { %v353_v46 = vld [vmem:[#allocation8 + $0xf0] sm:$0xff]  ;;  %v1281_v55 = vpack.c.bf16 %v801_v54, %v800_v53  ;;  %v803_v60 = vld [vmem:[#allocation9 + $0x18] sm:$0xff]  ;;  %v820_v62 = vld [vmem:[#allocation9 + $0xa0] sm:$0xff] }
  0x66   :  { %1242 = vmatpush1.bf16.msra.mxu0 %v1241_v44  ;;  %1325 = vmatpush1.bf16.msra.mxu1 %v1241_v44  ;;  %v1275_v44 = vpack.c.bf16 %v354_v40, %v352_v39  ;;  %v821_v63 = vld [vmem:[#allocation9 + $0xa8] sm:$0xff]  ;;  %v823_v5 = vld [vmem:[#allocation9 + $0xb8] sm:$0xff]  ;;  %v806_v7 = vld [vmem:[#allocation9 + $0x30] sm:$0xff] }
  0x67   :  { %1244 = vmatprep.subr.bf16.mxu0 %v1243_v45  ;;  %1318 = vmatprep.subr.bf16.mxu1 %v1243_v45  ;;  %v351_v45 = vld [vmem:[#allocation8 + $0xe0] sm:$0xff]  ;;  %v807_v8 = vld [vmem:[#allocation9 + $0x38] sm:$0xff]  ;;  %v809_v14 = vld [vmem:[#allocation9 + $0x48] sm:$0xff] }
  0x68   :  { %v1277_v49 = vpack.c.bf16 %v353_v46, %v351_v45  ;;  %v808_v13 = vld [vmem:[#allocation9 + $0x40] sm:$0xff]  ;;  %v826_v16 = vld [vmem:[#allocation9 + $0xd0] sm:$0xff]  ;;  %v829_v23 = vld [vmem:[#allocation9 + $0xe8] sm:$0xff] }
  0x69   :  { %v1297_v15 = vpack.c.bf16 %v809_v14, %v808_v13  ;;  %v828_v22 = vld [vmem:[#allocation9 + $0xe0] sm:$0xff]  ;;  %v831_v29 = vld [vmem:[#allocation9 + $0xf8] sm:$0xff]  ;;  %v814_v31 = vld [vmem:[#allocation9 + $0x70] sm:$0xff] }
  0x6a   :  { %1246 = vmatpush1.bf16.msra.mxu0 %v1245_v50  ;;  %1326 = vmatpush1.bf16.msra.mxu1 %v1245_v50  ;;  %v816_v50 = vld [vmem:[#allocation9 + $0x80] sm:$0xff]  ;;  %v1303_v24 = vpack.c.bf16 %v829_v23, %v828_v22  ;;  %v815_v32 = vld [vmem:[#allocation9 + $0x78] sm:$0xff] }
  0x6b   :  { %1248 = vmatprep.subr.bf16.mxu1 %v1247_v51  ;;  %v817_v51 = vld [vmem:[#allocation9 + $0x88] sm:$0xff]  ;;  %v150_v37 = vld [vmem:[%s2103_s2] sm:$0x3] }
  0x6c   :  { %v1279_v52 = vpack.c.bf16 %v817_v51, %v816_v50 }
  0x6d   :  { %227 = vmatmul.mubr.f32.vlgmr.msra.gmra.mrb[0].mxu0 %v1718_v56  ;;  %275 = vmatmul.mubr.f32.vlgmr.msra.gmra.mrb[0].mxu1 %v1720_v57 }
  0x6e   :  { %1250 = vmatpush1.bf16.msra.mxu1 %v1249_v58  ;;  %232 = vmatprep.mubr.f32.mxu0 %v1607_v0 }
  0x6f   :  { %280 = vmatprep.mubr.f32.mxu1 %v1607_v0  ;;  %1252 = vmatprep.subr.bf16.mxu1 %v1251_v59  ;;  %v802_v59 = vld [vmem:[#allocation9 + $0x10] sm:$0xff] }
  0x70   :  { %1280 = vmatprep.subr.bf16.mxu0 %v1279_v52  ;;  %v1285_v61 = vpack.c.bf16 %v803_v60, %v802_v59 }
  0x71   :  { %233 = vmatmul.mubr.f32.gmra.mrb[2].mxu0 %v1725_v1  ;;  %281 = vmatmul.mubr.f32.gmra.mrb[2].mxu1 %v1727_v2 }
  0x72   :  { %1254 = vmatpush1.bf16.msra.mxu1 %v1253_v3  ;;  %238 = vmatprep.mubr.f32.mxu0 %v1607_v0 }
  0x73   :  { %286 = vmatprep.mubr.f32.mxu1 %v1607_v0  ;;  %1256 = vmatprep.subr.bf16.mxu1 %v1255_v4  ;;  %v822_v4 = vld [vmem:[#allocation9 + $0xb0] sm:$0xff] }
  0x74   :  { %1282 = vmatpush3.bf16.msra.mxu0 %v1281_v55  ;;  %v1291_v6 = vpack.c.bf16 %v823_v5, %v822_v4 }
  0x75   :  { %239 = vmatmul.mubr.f32.gmra.mrb[4].mxu0 %v1733_v9  ;;  %287 = vmatmul.mubr.f32.gmra.mrb[4].mxu1 %v1735_v10 }
  0x76   :  { %1258 = vmatpush1.bf16.msra.mxu1 %v1257_v11  ;;  %244 = vmatprep.mubr.f32.mxu0 %v1607_v0  ;;  %v825_v11 = vld [vmem:[#allocation9 + $0xc8] sm:$0xff] }
  0x77   :  { %292 = vmatprep.mubr.f32.mxu1 %v1607_v0  ;;  %1260 = vmatprep.subr.bf16.mxu1 %v1259_v12 }
  0x79   :  { %245 = vmatmul.mubr.f32.gmra.mrb[6].mxu0 %v1741_v17  ;;  %293 = vmatmul.mubr.f32.gmra.mrb[6].mxu1 %v1743_v18 }
  0x7a   :  { %1262 = vmatpush1.bf16.msra.mxu1 %v1261_v19  ;;  %250 = vmatprep.mubr.f32.mxu0 %v1607_v0  ;;  %v810_v19 = vld [vmem:[#allocation9 + $0x50] sm:$0xff] }
  0x7b   :  { %298 = vmatprep.mubr.f32.mxu1 %v1607_v0  ;;  %1264 = vmatprep.subr.bf16.mxu1 %v1263_v20  ;;  %v811_v20 = vld [vmem:[#allocation9 + $0x58] sm:$0xff] }
  0x7c   :  { %v1301_v21 = vpack.c.bf16 %v811_v20, %v810_v19 }
  0x7d   :  { %251 = vmatmul.mubr.f32.gmra.mrb[8].mxu0 %v106_v25  ;;  %299 = vmatmul.mubr.f32.gmra.mrb[8].mxu1 %v1749_v26 }
  0x7e   :  { %1266 = vmatpush1.bf16.msra.mxu1 %v1265_v27  ;;  %256 = vmatprep.mubr.f32.mxu0 %v1607_v0 }
  0x7f   :  { %304 = vmatprep.mubr.f32.mxu1 %v1607_v0  ;;  %1268 = vmatprep.subr.bf16.mxu1 %v1267_v28  ;;  %v830_v28 = vld [vmem:[#allocation9 + $0xf0] sm:$0xff] }
  0x80   :  { %v1307_v30 = vpack.c.bf16 %v831_v29, %v830_v28 }
  0x81   :  { %257 = vmatmul.mubr.f32.gmra.mrb[10].mxu0 %v107_v33  ;;  %305 = vmatmul.mubr.f32.gmra.mrb[10].mxu1 %v115_v34 }
  0x82   :  { %1270 = vmatpush1.bf16.msra.mxu1 %v1269_v35  ;;  %262 = vmatprep.mubr.f32.mxu0 %v1607_v0 }
  0x83   :  { %310 = vmatprep.mubr.f32.mxu1 %v1607_v0  ;;  %1272 = vmatprep.subr.bf16.mxu1 %v1271_v36 }
  0x85   :  { %263 = vmatmul.mubr.f32.gmra.mrb[12].mxu0 %v108_v41  ;;  %311 = vmatmul.mubr.f32.gmra.mrb[12].mxu1 %v116_v42 }
  0x86   :  { %1274 = vmatpush1.bf16.msra.mxu1 %v1273_v43  ;;  %268 = vmatprep.mubr.f32.mxu0 %v1607_v0 }
  0x87   :  { %316 = vmatprep.mubr.f32.mxu1 %v1607_v0  ;;  %1276 = vmatprep.subr.bf16.mxu1 %v1275_v44 }
  0x89   :  { %269 = vmatmul.mubr.f32.gmra.mrb[14].mxu0 %v109_v47  ;;  %317 = vmatmul.mubr.f32.gmra.mrb[14].mxu1 %v117_v48 }
  0x8a   :  { %1278 = vmatpush1.bf16.msra.mxu1 %v1277_v49  ;;  %431 = vmatprep.mubr.f32.mxu1 %v1607_v0 }
  0x8d   :  { %432 = vmatmul.mubr.f32.vlgmr.msra.gmra.mrb[16].mxu1 %v1718_v56  ;;  %v818_v56 = vld [vmem:[#allocation9 + $0x90] sm:$0xff] }
  0x8e   :  { %437 = vmatprep.mubr.f32.mxu1 %v1607_v0 }
  0x91   :  { %438 = vmatmul.mubr.f32.gmra.mrb[18].mxu1 %v1725_v1  ;;  %v804_v1 = vld [vmem:[#allocation9 + $0x20] sm:$0xff] }
  0x92   :  { %443 = vmatprep.mubr.f32.mxu1 %v1607_v0 }
  0x95   :  { %444 = vmatmul.mubr.f32.gmra.mrb[20].mxu1 %v1733_v9  ;;  %v1293_v9 = vpack.c.bf16 %v807_v8, %v806_v7 }
  0x96   :  { %449 = vmatprep.mubr.f32.mxu1 %v1607_v0 }
  0x99   :  { %450 = vmatmul.mubr.f32.gmra.mrb[22].mxu1 %v1741_v17  ;;  %v827_v17 = vld [vmem:[#allocation9 + $0xd8] sm:$0xff] }
  0x9a   :  { %455 = vmatprep.mubr.f32.mxu1 %v1607_v0 }
  0x9d   :  { %456 = vmatmul.mubr.f32.gmra.mrb[24].mxu1 %v106_v25  ;;  %v812_v25 = vld [vmem:[#allocation9 + $0x60] sm:$0xff] }
  0x9e   :  { %461 = vmatprep.mubr.f32.mxu1 %v1607_v0 }
  0xa1   :  { %462 = vmatmul.mubr.f32.gmra.mrb[26].mxu1 %v107_v33  ;;  %v1309_v33 = vpack.c.bf16 %v815_v32, %v814_v31 }
  0xa2   :  { %467 = vmatprep.mubr.f32.mxu1 %v1607_v0 }
  0xa5   :  { %468 = vmatmul.mubr.f32.gmra.mrb[28].mxu1 %v108_v41 }
  0xa6   :  { %473 = vmatprep.mubr.f32.mxu1 %v1607_v0 }
  0xa9   :  { %474 = vmatmul.mubr.f32.gmra.mrb[30].mxu1 %v109_v47 }
  0xaa   :  { %479 = vmatprep.mubr.f32.mxu1 %v1607_v0 }
  0xad   :  { %480 = vmatmul.mubr.f32.gmra.mrb[32].mxu1 %v1720_v57  ;;  %v819_v57 = vld [vmem:[#allocation9 + $0x98] sm:$0xff] }
  0xae   :  { %485 = vmatprep.mubr.f32.mxu1 %v1607_v0  ;;  %v1283_v58 = vpack.c.bf16 %v819_v57, %v818_v56 }
  0xb0   :  { %1284 = vmatprep.subr.bf16.mxu0 %v1283_v58 }
  0xb1   :  { %486 = vmatmul.mubr.f32.gmra.mrb[34].mxu1 %v1727_v2  ;;  %1286 = vmatpush3.bf16.msra.mxu0 %v1285_v61  ;;  %v805_v2 = vld [vmem:[#allocation9 + $0x28] sm:$0xff] }
  0xb2   :  { %491 = vmatprep.mubr.f32.mxu1 %v1607_v0  ;;  %v1289_v3 = vpack.c.bf16 %v805_v2, %v804_v1 }
  0xb5   :  { %492 = vmatmul.mubr.f32.gmra.mrb[36].mxu1 %v1735_v10  ;;  %v824_v10 = vld [vmem:[#allocation9 + $0xc0] sm:$0xff] }
  0xb6   :  { %497 = vmatprep.mubr.f32.mxu1 %v1607_v0  ;;  %v1295_v12 = vpack.c.bf16 %v825_v11, %v824_v10 }
  0xb9   :  { %498 = vmatmul.mubr.f32.gmra.mrb[38].mxu1 %v1743_v18  ;;  %v1299_v18 = vpack.c.bf16 %v827_v17, %v826_v16 }
  0xba   :  { %503 = vmatprep.mubr.f32.mxu1 %v1607_v0 }
  0xbd   :  { %504 = vmatmul.mubr.f32.gmra.mrb[40].mxu1 %v1749_v26  ;;  %v813_v26 = vld [vmem:[#allocation9 + $0x68] sm:$0xff] }
  0xbe   :  { %509 = vmatprep.mubr.f32.mxu1 %v1607_v0  ;;  %v1305_v27 = vpack.c.bf16 %v813_v26, %v812_v25 }
  0xc1   :  { %510 = vmatmul.mubr.f32.gmra.mrb[42].mxu1 %v115_v34  ;;  %v152_v34 = vlaneseq }
  0xc2   :  { %515 = vmatprep.mubr.f32.mxu1 %v1607_v0 }
  0xc3   :  { %v1784_v35 = vshrl.u32 %v152_v34, 7 }
  0xc5   :  { %516 = vmatmul.mubr.f32.gmra.mrb[44].mxu1 %v116_v42  ;;  %v154_v36 = vsub.s32 0, %v1784_v35  ;;  %v158_v38 = vsub.s32 1, %v1784_v35 }
  0xc6   :  { %521 = vmatprep.mubr.f32.mxu1 %v1607_v0  ;;  %v1287_v0 = vpack.c.bf16 %v821_v63, %v820_v62 }
  0xc7   :  { %v1793_v39 = vrot.slane %v150_v37, %v154_v36  ;;  %v1797_v40 = vrot.slane %v150_v37, %v158_v38 }
  0xc8   :  { %1288 = vmatprep.subr.bf16.mxu0 %v1287_v0 }
  0xc9   :  { %522 = vmatmul.mubr.f32.gmra.mrb[46].mxu1 %v117_v48  ;;  %1290 = vmatpush3.bf16.msra.mxu0 %v1289_v3 }
  0xca   :  { %1292 = vmatprep.subr.bf16.mxu0 %v1291_v6 }
  0xcd   :  { %1294 = vmatpush3.bf16.msra.mxu0 %v1293_v9 }
  0xce   :  { %1296 = vmatprep.subr.bf16.mxu0 %v1295_v12 }
  0xd1   :  { %1298 = vmatpush3.bf16.msra.mxu0 %v1297_v15 }
  0xd2   :  { %1300 = vmatprep.subr.bf16.mxu0 %v1299_v18 }
  0xd5   :  { %1302 = vmatpush3.bf16.msra.mxu0 %v1301_v21 }
  0xd6   :  { %1304 = vmatprep.subr.bf16.mxu0 %v1303_v24 }
  0xd9   :  { %1306 = vmatpush3.bf16.msra.mxu0 %v1305_v27 }
  0xda   :  { %1308 = vmatprep.subr.bf16.mxu0 %v1307_v30 }
  0xdd   :  { %1310 = vmatpush3.bf16.msra.mxu0 %v1309_v33 }
 0x140   :  { %v228_v41 = vpop.f32.mrb[0].mxu0  ;;  %v276_v42 = vpop.f32.mrb[0].mxu1 }
 0x141   :  { %v1800_v43 = vadd.f32 %v228_v41, %v1793_v39  ;;  %v230_v44 = vpop.f32.mrb[1].mxu0  ;;  %v278_v45 = vpop.f32.mrb[1].mxu1  ;;  %v1822_v63 = vadd.f32 %v276_v42, %v1793_v39 }
 0x142   :  { %v1803_v46 = vadd.f32 %v230_v44, %v1797_v40  ;;  %v1828_v1 = vadd.f32 %v278_v45, %v1797_v40 }
 0x143   :  { %v1102_v47 = vmul.f32 -1.442695, %v1800_v43  ;;  %v1118_v10 = vmul.f32 -1.442695, %v1822_v63 }
 0x144   :  { %v1103_v48 = vmul.f32 -1.442695, %v1803_v46  ;;  %v234_v49 = vpop.f32.mrb[2].mxu0  ;;  %v282_v50 = vpop.f32.mrb[2].mxu1  ;;  %v1119_v14 = vmul.f32 -1.442695, %v1828_v1 }
 0x145   :  { %1337 = vpow2.f32 %v1102_v47  ;;  %v1808_v51 = vadd.f32 %v234_v49, %v1793_v39  ;;  %v236_v52 = vpop.f32.mrb[3].mxu0  ;;  %v284_v53 = vpop.f32.mrb[3].mxu1  ;;  %v1840_v11 = vadd.f32 %v282_v50, %v1793_v39 }
 0x146   :  { %v1811_v54 = vadd.f32 %v236_v52, %v1797_v40  ;;  %1339 = vpow2.f32 %v1103_v48  ;;  %v1847_v15 = vadd.f32 %v284_v53, %v1797_v40 }
 0x147   :  { %v1104_v55 = vmul.f32 -1.442695, %v1808_v51  ;;  %v1120_v23 = vmul.f32 -1.442695, %v1840_v11 }
 0x148   :  { %v1105_v56 = vmul.f32 -1.442695, %v1811_v54  ;;  %v240_v57 = vpop.f32.mrb[4].mxu0  ;;  %v288_v58 = vpop.f32.mrb[4].mxu1  ;;  %v1121_v27 = vmul.f32 -1.442695, %v1847_v15 }
 0x149   :  { %1341 = vpow2.f32 %v1104_v55  ;;  %v1816_v59 = vadd.f32 %v240_v57, %v1793_v39  ;;  %v1819_v60 = vadd.f32 %v288_v58, %v1793_v39  ;;  %v242_v61 = vpop.f32.mrb[5].mxu0  ;;  %v290_v62 = vpop.f32.mrb[5].mxu1 }
 0x14a   :  { %v1825_v0 = vadd.f32 %v242_v61, %v1797_v40  ;;  %1343 = vpow2.f32 %v1105_v56  ;;  %v1856_v28 = vadd.f32 %v290_v62, %v1797_v40 }
 0x14b   :  { %v1106_v2 = vmul.f32 -1.442695, %v1816_v59  ;;  %v1122_v41 = vmul.f32 -1.442695, %v1819_v60 }
 0x14c   :  { %v1107_v3 = vmul.f32 -1.442695, %v1825_v0  ;;  %v246_v4 = vpop.f32.mrb[6].mxu0  ;;  %v294_v5 = vpop.f32.mrb[6].mxu1  ;;  %v1123_v47 = vmul.f32 -1.442695, %v1856_v28 }
 0x14d   :  { %1345 = vpow2.f32 %v1106_v2  ;;  %v1833_v6 = vadd.f32 %v246_v4, %v1793_v39  ;;  %v1836_v7 = vadd.f32 %v294_v5, %v1793_v39  ;;  %v248_v8 = vpop.f32.mrb[7].mxu0  ;;  %v296_v9 = vpop.f32.mrb[7].mxu1  ;;  %v355_v2 = vld [vmem:[%s2105_s4] sm:$0x3] }
 0x14e   :  { %v1843_v12 = vadd.f32 %v296_v9, %v1797_v40  ;;  %1347 = vpow2.f32 %v1107_v3  ;;  %v1870_v50 = vadd.f32 %v248_v8, %v1797_v40 }
 0x14f   :  { %v1338_v13 = vpop.eup %1337  ;;  %v1108_v16 = vmul.f32 -1.442695, %v1833_v6 }
 0x150   :  { %v624_v17 = vadd.f32 1.0, %v1338_v13  ;;  %v252_v18 = vpop.f32.mrb[8].mxu0  ;;  %v1340_v19 = vpop.eup %1339  ;;  %v1109_v9 = vmul.f32 -1.442695, %v1870_v50 }
 0x151   :  { %1349 = vpow2.f32 %v1108_v16  ;;  %v300_v20 = vpop.f32.mrb[8].mxu1  ;;  %v254_v21 = vpop.f32.mrb[9].mxu0  ;;  %v625_v22 = vadd.f32 1.0, %v1340_v19  ;;  %v1875_v58 = vadd.f32 %v252_v18, %v1793_v39  ;;  %v1899_v19 = vrot.slane %v355_v2, %v154_v36 }
 0x152   :  { %1351 = vpow2.f32 %v1118_v10  ;;  %v1852_v24 = vadd.f32 %v300_v20, %v1793_v39  ;;  %v302_v25 = vpop.f32.mrb[9].mxu1  ;;  %v1888_v10 = vadd.f32 %v254_v21, %v1797_v40 }
 0x153   :  { %v1342_v26 = vpop.eup %1341  ;;  %1353 = vpow2.f32 %v1119_v14  ;;  %v1859_v29 = vadd.f32 %v302_v25, %v1797_v40  ;;  %v1907_v25 = vrot.slane %v355_v2, %v158_v38 }
 0x154   :  { %1355 = vrcp.f32 %v624_v17  ;;  %v626_v30 = vadd.f32 1.0, %v1342_v26  ;;  %v258_v31 = vpop.f32.mrb[10].mxu0  ;;  %v1344_v32 = vpop.eup %1343  ;;  %v1111_v36 = vmul.f32 -1.442695, %v1888_v10 }
 0x155   :  { %1357 = vrcp.f32 %v625_v22  ;;  %v306_v33 = vpop.f32.mrb[10].mxu1  ;;  %v260_v34 = vpop.f32.mrb[11].mxu0  ;;  %v627_v37 = vadd.f32 1.0, %v1344_v32  ;;  %v1893_v16 = vadd.f32 %v258_v31, %v1793_v39  ;;  %v1110_v22 = vmul.f32 -1.442695, %v1875_v58 }
 0x156   :  { %1359 = vpow2.f32 %v1120_v23  ;;  %v1863_v42 = vadd.f32 %v306_v33, %v1793_v39  ;;  %v308_v44 = vpop.f32.mrb[11].mxu1  ;;  %v1914_v32 = vadd.f32 %v260_v34, %v1797_v40 }
 0x157   :  { %v1346_v45 = vpop.eup %1345  ;;  %1361 = vpow2.f32 %v1121_v27  ;;  %v1867_v48 = vadd.f32 %v308_v44, %v1797_v40  ;;  %v1112_v38 = vmul.f32 -1.442695, %v1893_v16 }
 0x158   :  { %1363 = vrcp.f32 %v626_v30  ;;  %v628_v49 = vadd.f32 1.0, %v1346_v45  ;;  %v264_v52 = vpop.f32.mrb[12].mxu0  ;;  %v1348_v53 = vpop.eup %1347  ;;  %v1113_v2 = vmul.f32 -1.442695, %v1914_v32 }
 0x159   :  { %1365 = vrcp.f32 %v627_v37  ;;  %v312_v55 = vpop.f32.mrb[12].mxu1  ;;  %v1872_v56 = vpop.f32.mrb[13].mxu0  ;;  %v629_v57 = vadd.f32 1.0, %v1348_v53  ;;  %v1921_v53 = vadd.f32 %v264_v52, %v1793_v39 }
 0x15a   :  { %1367 = vpow2.f32 %v1122_v41  ;;  %v1878_v61 = vadd.f32 %v312_v55, %v1793_v39  ;;  %v314_v62 = vpop.f32.mrb[13].mxu1 }
 0x15b   :  { %v1350_v3 = vpop.eup %1349  ;;  %1369 = vpow2.f32 %v1123_v47  ;;  %v1884_v4 = vadd.f32 %v314_v62, %v1797_v40 }
 0x15c   :  { %v1352_v5 = vpop.eup %1351  ;;  %1371 = vrcp.f32 %v628_v49  ;;  %v630_v8 = vadd.f32 1.0, %v1350_v3  ;;  %v1890_v13 = vpop.f32.mrb[14].mxu0 }
 0x15d   :  { %v1354_v14 = vpop.eup %1353  ;;  %1373 = vrcp.f32 %v629_v57  ;;  %v318_v17 = vpop.f32.mrb[14].mxu1  ;;  %v640_v27 = vadd.f32 1.0, %v1352_v5 }
 0x15e   :  { %v1895_v18 = vpop.f32.mrb[15].mxu0  ;;  %v1356_v20 = vpop.eup %1355  ;;  %v1903_v21 = vadd.f32 %v318_v17, %v1793_v39  ;;  %1375 = vrcp.f32 %v630_v8  ;;  %v641_v35 = vadd.f32 1.0, %v1354_v14 }
 0x15f   :  { %v320_v23 = vpop.f32.mrb[15].mxu1  ;;  %v1358_v26 = vpop.eup %1357  ;;  %1377 = vpow2.f32 %v1109_v9  ;;  %v720_v41 = vmul.f32 %v1356_v20, %v1800_v43 }
 0x160   :  { %v1910_v30 = vadd.f32 %v320_v23, %v1797_v40  ;;  %v1360_v31 = vpop.eup %1359  ;;  %v433_v33 = vpop.f32.mrb[16].mxu1  ;;  %v721_v49 = vmul.f32 %v1358_v26, %v1803_v46  ;;  %1379 = vpow2.f32 %v1110_v22  ;;  %v1114_v22 = vmul.f32 -1.442695, %v1921_v53 }
 0x161   :  { %v1362_v37 = vpop.eup %1361  ;;  %v434_v44 = vadd.f32 %v433_v33, %v1899_v19  ;;  %v435_v45 = vpop.f32.mrb[17].mxu1  ;;  %1381 = vrcp.f32 %v640_v27  ;;  %v642_v57 = vadd.f32 1.0, %v1360_v31 }
 0x162   :  { %v1364_v47 = vpop.eup %1363  ;;  %v436_v34 = vadd.f32 %v435_v45, %v1907_v25  ;;  %1383 = vpow2.f32 %v1111_v36  ;;  %v643_v9 = vadd.f32 1.0, %v1362_v37 }
 0x163   :  { %v1366_v55 = vpop.eup %1365  ;;  %v752_v62 = vmul.f32 %v720_v41, %v434_v44  ;;  %1385 = vrcp.f32 %v641_v35  ;;  %v722_v46 = vmul.f32 %v1364_v47, %v1808_v51  ;;  %v1124_v51 = vmul.f32 -1.442695, %v1836_v7 }
 0x164   :  { %v1368_v43 = vpop.eup %1367  ;;  %v753_v3 = vmul.f32 %v721_v49, %v436_v34  ;;  %v439_v5 = vpop.f32.mrb[18].mxu1  ;;  %v723_v20 = vmul.f32 %v1366_v55, %v1811_v54  ;;  %1387 = vpow2.f32 %v1112_v38 }
 0x165   :  { %v1370_v8 = vpop.eup %1369  ;;  %v440_v52 = vadd.f32 %v439_v5, %v1899_v19  ;;  %v441_v14 = vpop.f32.mrb[19].mxu1  ;;  %1389 = vrcp.f32 %v642_v57  ;;  %v644_v27 = vadd.f32 1.0, %v1368_v43  ;;  %v1125_v57 = vmul.f32 -1.442695, %v1843_v12 }
 0x166   :  { %v1372_v17 = vpop.eup %1371  ;;  %v442_v23 = vadd.f32 %v441_v14, %v1907_v25  ;;  %896 = vmatprep.mubr.f32.mxu0 %v753_v3  ;;  %1391 = vpow2.f32 %v1113_v2  ;;  %v645_v45 = vadd.f32 1.0, %v1370_v8 }
 0x167   :  { %v1374_v26 = vpop.eup %1373  ;;  %v754_v31 = vmul.f32 %v722_v46, %v440_v52  ;;  %897 = vmatmul.mubr.f32.vlgmr.msra.gmra.mrb[16].mxu0 %v752_v62  ;;  %1393 = vrcp.f32 %v643_v9  ;;  %v724_v54 = vmul.f32 %v1372_v17, %v1816_v59  ;;  %v1126_v46 = vmul.f32 -1.442695, %v1852_v24 }
 0x168   :  { %v755_v36 = vmul.f32 %v723_v20, %v442_v23  ;;  %v445_v33 = vpop.f32.mrb[20].mxu1  ;;  %v1376_v37 = vpop.eup %1375  ;;  %v725_v44 = vmul.f32 %v1374_v26, %v1825_v0  ;;  %1395 = vpow2.f32 %v1114_v22  ;;  %v1950_v26 = vadd.f32 %v1872_v56, %v1797_v40 }
 0x169   :  { %v446_v41 = vadd.f32 %v445_v33, %v1899_v19  ;;  %v447_v35 = vpop.f32.mrb[21].mxu1  ;;  %v1378_v38 = vpop.eup %1377  ;;  %1397 = vrcp.f32 %v644_v27  ;;  %v726_v2 = vmul.f32 %v1376_v37, %v1833_v6  ;;  %v1127_v6 = vmul.f32 -1.442695, %v1859_v29 }
 0x16a   :  { %v448_v47 = vadd.f32 %v447_v35, %v1907_v25  ;;  %901 = vmatprep.mubr.f32.mxu0 %v755_v36  ;;  %v631_v49 = vadd.f32 1.0, %v1378_v38  ;;  %v1380_v55 = vpop.eup %1379  ;;  %1399 = vpow2.f32 %v1124_v51  ;;  %v1128_v51 = vmul.f32 -1.442695, %v1863_v42 }
 0x16b   :  { %v756_v34 = vmul.f32 %v724_v54, %v446_v41  ;;  %902 = vmatmul.mubr.f32.gmra.mrb[18].mxu0 %v754_v31  ;;  %v1936_v43 = vpop.eup %1381  ;;  %v632_v0 = vadd.f32 1.0, %v1380_v55  ;;  %v1957_v37 = vadd.f32 %v1890_v13, %v1793_v39  ;;  %v1129_v41 = vmul.f32 -1.442695, %v1867_v48 }
 0x16c   :  { %v757_v59 = vmul.f32 %v725_v44, %v448_v47  ;;  %v451_v62 = vpop.f32.mrb[22].mxu1  ;;  %1401 = vrcp.f32 %v631_v49  ;;  %v1384_v8 = vpop.eup %1383  ;;  %v1115_v44 = vmul.f32 -1.442695, %v1950_v26  ;;  %v1130_v39 = vmul.f32 -1.442695, %v1878_v61 }
 0x16d   :  { %v452_v3 = vadd.f32 %v451_v62, %v1899_v19  ;;  %v453_v5 = vpop.f32.mrb[23].mxu1  ;;  %1403 = vrcp.f32 %v645_v45  ;;  %v1941_v9 = vpop.eup %1385  ;;  %v633_v52 = vadd.f32 1.0, %v1384_v8  ;;  %v1965_v45 = vadd.f32 %v1895_v18, %v1797_v40 }
 0x16e   :  { %906 = vmatprep.mubr.f32.mxu0 %v757_v59  ;;  %1405 = vrcp.f32 %v632_v0  ;;  %v1388_v17 = vpop.eup %1387  ;;  %v454_v13 = vadd.f32 %v453_v5, %v1907_v25  ;;  %v1116_v55 = vmul.f32 -1.442695, %v1957_v37  ;;  %v1131_v62 = vmul.f32 -1.442695, %v1884_v4 }
 0x16f   :  { %v1943_v14 = vmul.f32 %v726_v2, %v452_v3  ;;  %907 = vmatmul.mubr.f32.gmra.mrb[20].mxu0 %v756_v34  ;;  %1407 = vpow2.f32 %v1125_v57  ;;  %v1946_v22 = vpop.eup %1389  ;;  %v634_v23 = vadd.f32 1.0, %v1388_v17  ;;  %v1117_v3 = vmul.f32 -1.442695, %v1965_v45 }
 0x170   :  { %v457_v20 = vpop.f32.mrb[24].mxu1  ;;  %1409 = vrcp.f32 %v633_v52  ;;  %v1392_v31 = vpop.eup %1391 }
 0x171   :  { %v459_v27 = vpop.f32.mrb[25].mxu1  ;;  %1411 = vpow2.f32 %v1126_v46  ;;  %v1953_v36 = vpop.eup %1393  ;;  %v635_v33 = vadd.f32 1.0, %v1392_v31  ;;  %v458_v40 = vadd.f32 %v457_v20, %v1899_v19  ;;  %v1133_v20 = vmul.f32 -1.442695, %v1910_v30 }
 0x172   :  { %1413 = vrcp.f32 %v634_v23  ;;  %v1396_v54 = vpop.eup %1395 }
 0x173   :  { %1415 = vpow2.f32 %v1127_v6  ;;  %v1960_v56 = vpop.eup %1397  ;;  %v636_v38 = vadd.f32 1.0, %v1396_v54  ;;  %v1132_v6 = vmul.f32 -1.442695, %v1903_v21 }
 0x174   :  { %v463_v35 = vpop.f32.mrb[26].mxu1  ;;  %1417 = vrcp.f32 %v635_v33  ;;  %v1400_v49 = vpop.eup %1399 }
 0x175   :  { %v465_v47 = vpop.f32.mrb[27].mxu1  ;;  %1419 = vpow2.f32 %v1128_v51  ;;  %v646_v0 = vadd.f32 1.0, %v1400_v49  ;;  %v464_v33 = vadd.f32 %v463_v35, %v1899_v19 }
 0x176   :  { %v1402_v34 = vpop.eup %1401  ;;  %1421 = vrcp.f32 %v636_v38 }
 0x177   :  { %v1970_v57 = vpop.eup %1403  ;;  %v727_v59 = vmul.f32 %v1402_v34, %v1870_v50  ;;  %1423 = vpow2.f32 %v1129_v41  ;;  %v460_v50 = vadd.f32 %v459_v27, %v1907_v25 }
 0x178   :  { %v469_v18 = vpop.f32.mrb[28].mxu1  ;;  %v1406_v2 = vpop.eup %1405  ;;  %1425 = vpow2.f32 %v1115_v44 }
 0x179   :  { %v1976_v5 = vpop.f32.mrb[29].mxu1  ;;  %v1408_v8 = vpop.eup %1407  ;;  %v728_v46 = vmul.f32 %v1406_v2, %v1875_v58  ;;  %1427 = vpow2.f32 %v1130_v39  ;;  %v759_v52 = vmul.f32 %v727_v59, %v454_v13 }
 0x17a   :  { %v1410_v17 = vpop.eup %1409  ;;  %1429 = vpow2.f32 %v1116_v55  ;;  %v647_v41 = vadd.f32 1.0, %v1408_v8 }
 0x17b   :  { %v1412_v23 = vpop.eup %1411  ;;  %v729_v31 = vmul.f32 %v1410_v17, %v1888_v10  ;;  %1431 = vpow2.f32 %v1131_v62  ;;  %v760_v51 = vmul.f32 %v728_v46, %v458_v40  ;;  %911 = vmatprep.mubr.f32.mxu0 %v759_v52  ;;  %v466_v10 = vadd.f32 %v465_v47, %v1907_v25 }
 0x17c   :  { %v1984_v54 = vpop.f32.mrb[30].mxu1  ;;  %v1414_v58 = vpop.eup %1413  ;;  %1433 = vpow2.f32 %v1117_v3  ;;  %912 = vmatmul.mubr.f32.gmra.mrb[22].mxu0 %v1943_v14  ;;  %v648_v13 = vadd.f32 1.0, %v1412_v23  ;;  %v470_v14 = vadd.f32 %v469_v18, %v1899_v19  ;;  %v736_v40 = vmul.f32 %v1936_v43, %v1822_v63 }
 0x17d   :  { %v1987_v27 = vpop.f32.mrb[31].mxu1  ;;  %v1416_v38 = vpop.eup %1415  ;;  %1435 = vrcp.f32 %v646_v0  ;;  %v730_v44 = vmul.f32 %v1414_v58, %v1893_v16  ;;  %v761_v49 = vmul.f32 %v729_v31, %v460_v50 }
 0x17e   :  { %v1418_v39 = vpop.eup %1417  ;;  %1437 = vpow2.f32 %v1132_v6  ;;  %v649_v16 = vadd.f32 1.0, %v1416_v38 }
 0x17f   :  { %v1420_v35 = vpop.eup %1419  ;;  %v731_v34 = vmul.f32 %v1418_v39, %v1914_v32  ;;  %1439 = vpow2.f32 %v1133_v20  ;;  %v762_v55 = vmul.f32 %v730_v44, %v464_v33  ;;  %916 = vmatprep.mubr.f32.mxu0 %v761_v49  ;;  %v737_v32 = vmul.f32 %v1941_v9, %v1828_v1 }
 0x180   :  { %v481_v59 = vpop.f32.mrb[32].mxu1  ;;  %v1422_v62 = vpop.eup %1421  ;;  %1441 = vrcp.f32 %v647_v41  ;;  %917 = vmatmul.mubr.f32.gmra.mrb[24].mxu0 %v760_v51  ;;  %v650_v52 = vadd.f32 1.0, %v1420_v35  ;;  %v738_v1 = vmul.f32 %v1946_v22, %v1840_v11  ;;  %v739_v33 = vmul.f32 %v1953_v36, %v1847_v15 }
 0x181   :  { %v482_v47 = vadd.f32 %v481_v59, %v1899_v19  ;;  %v483_v2 = vpop.f32.mrb[33].mxu1  ;;  %v1424_v0 = vpop.eup %1423  ;;  %v732_v3 = vmul.f32 %v1422_v62, %v1921_v53  ;;  %v763_v8 = vmul.f32 %v731_v34, %v466_v10  ;;  %1443 = vrcp.f32 %v648_v13 }
 0x182   :  { %v484_v18 = vadd.f32 %v483_v2, %v1907_v25  ;;  %v1426_v46 = vpop.eup %1425  ;;  %1445 = vrcp.f32 %v649_v16  ;;  %v651_v53 = vadd.f32 1.0, %v1424_v0  ;;  %v740_v35 = vmul.f32 %v1960_v56, %v1819_v60 }
 0x183   :  { %v2000_v50 = vmul.f32 %v736_v40, %v482_v47  ;;  %v1428_v63 = vpop.eup %1427  ;;  %v637_v43 = vadd.f32 1.0, %v1426_v46  ;;  %v2002_v17 = vmul.f32 %v732_v3, %v470_v14  ;;  %921 = vmatprep.mubr.f32.mxu0 %v763_v8  ;;  %v741_v14 = vmul.f32 %v1970_v57, %v1856_v28 }
 0x184   :  { %v2004_v6 = vmul.f32 %v737_v32, %v484_v18  ;;  %v487_v20 = vpop.f32.mrb[34].mxu1  ;;  %v1430_v23 = vpop.eup %1429  ;;  %922 = vmatmul.mubr.f32.gmra.mrb[26].mxu0 %v762_v55  ;;  %v652_v11 = vadd.f32 1.0, %v1428_v63  ;;  %v472_v18 = vadd.f32 %v1976_v5, %v1907_v25 }
 0x185   :  { %v488_v9 = vadd.f32 %v487_v20, %v1899_v19  ;;  %v489_v31 = vpop.f32.mrb[35].mxu1  ;;  %v1432_v51 = vpop.eup %1431  ;;  %1447 = vrcp.f32 %v637_v43  ;;  %v638_v58 = vadd.f32 1.0, %v1430_v23 }
 0x186   :  { %v490_v41 = vadd.f32 %v489_v31, %v1907_v25  ;;  %v1434_v38 = vpop.eup %1433  ;;  %1449 = vrcp.f32 %v650_v52  ;;  %v653_v15 = vadd.f32 1.0, %v1432_v51 }
 0x187   :  { %v2012_v44 = vmul.f32 %v738_v1, %v488_v9  ;;  %v1436_v49 = vpop.eup %1435  ;;  %1451 = vrcp.f32 %v638_v58  ;;  %v639_v22 = vadd.f32 1.0, %v1434_v38  ;;  %v478_v58 = vadd.f32 %v1987_v27, %v1907_v25 }
 0x188   :  { %v2014_v10 = vmul.f32 %v739_v33, %v490_v41  ;;  %v493_v39 = vpop.f32.mrb[36].mxu1  ;;  %v1438_v13 = vpop.eup %1437  ;;  %1453 = vrcp.f32 %v651_v53  ;;  %v742_v2 = vmul.f32 %v1436_v49, %v1836_v7 }
 0x189   :  { %v494_v36 = vadd.f32 %v493_v39, %v1899_v19  ;;  %v495_v34 = vpop.f32.mrb[37].mxu1  ;;  %v1440_v55 = vpop.eup %1439  ;;  %1455 = vrcp.f32 %v639_v22  ;;  %v654_v16 = vadd.f32 1.0, %v1438_v13 }
 0x18a   :  { %v496_v59 = vadd.f32 %v495_v34, %v1907_v25  ;;  %v1442_v62 = vpop.eup %1441  ;;  %1457 = vrcp.f32 %v652_v11  ;;  %v655_v0 = vadd.f32 1.0, %v1440_v55 }
 0x18b   :  { %v2022_v40 = vmul.f32 %v740_v35, %v494_v36  ;;  %v1444_v56 = vpop.eup %1443  ;;  %1459 = vrcp.f32 %v653_v15  ;;  %v743_v28 = vmul.f32 %v1442_v62, %v1843_v12  ;;  %v476_v12 = vadd.f32 %v1984_v54, %v1899_v19 }
 0x18c   :  { %v2024_v47 = vmul.f32 %v741_v14, %v496_v59  ;;  %v499_v60 = vpop.f32.mrb[38].mxu1  ;;  %v1446_v8 = vpop.eup %1445  ;;  %v744_v63 = vmul.f32 %v1444_v56, %v1852_v24  ;;  %1461 = vrcp.f32 %v654_v16 }
 0x18d   :  { %v500_v32 = vadd.f32 %v499_v60, %v1899_v19  ;;  %v501_v3 = vpop.f32.mrb[39].mxu1  ;;  %1463 = vrcp.f32 %v655_v0  ;;  %v745_v5 = vmul.f32 %v1446_v8, %v1859_v29 }
 0x18e   :  { %v502_v57 = vadd.f32 %v501_v3, %v1907_v25 }
 0x18f   :  { %v2032_v46 = vmul.f32 %v742_v2, %v500_v32  ;;  %v1448_v52 = vpop.eup %1447 }
 0x190   :  { %v775_v7 = vmul.f32 %v743_v28, %v502_v57  ;;  %v505_v43 = vpop.f32.mrb[40].mxu1  ;;  %v1450_v20 = vpop.eup %1449  ;;  %v733_v23 = vmul.f32 %v1448_v52, %v1950_v26 }
 0x191   :  { %v506_v1 = vadd.f32 %v505_v43, %v1899_v19  ;;  %v507_v53 = vpop.f32.mrb[41].mxu1  ;;  %v1452_v9 = vpop.eup %1451  ;;  %v746_v54 = vmul.f32 %v1450_v20, %v1863_v42  ;;  %v1467_v43 = vld [vmem:[#allocation3 + $0x10] sm:$0xff] }
 0x192   :  { %v508_v31 = vadd.f32 %v507_v53, %v1907_v25  ;;  %v1454_v51 = vpop.eup %1453  ;;  %v734_v24 = vmul.f32 %v1452_v9, %v1957_v37  ;;  %v765_v33 = vmul.f32 %v733_v23, %v472_v18 }
 0x193   :  { %v776_v26 = vmul.f32 %v744_v63, %v506_v1  ;;  %v1456_v41 = vpop.eup %1455  ;;  %v747_v37 = vmul.f32 %v1454_v51, %v1867_v48 }
 0x194   :  { %v777_v38 = vmul.f32 %v745_v5, %v508_v31  ;;  %v511_v49 = vpop.f32.mrb[42].mxu1  ;;  %v735_v11 = vmul.f32 %v1456_v41, %v1965_v45  ;;  %v766_v22 = vmul.f32 %v734_v24, %v476_v12  ;;  %926 = vmatprep.mubr.f32.mxu0 %v765_v33  ;;  %v1458_v13 = vpop.eup %1457  ;;  %v1468_v31 = vld [vmem:[#allocation3 + $0x18] sm:$0xff]  ;;  %v1469_v41 = vld [vmem:[#allocation3 + $0x20] sm:$0xff] }
 0x195   :  { %v512_v29 = vadd.f32 %v511_v49, %v1899_v19  ;;  %v513_v39 = vpop.f32.mrb[43].mxu1  ;;  %927 = vmatmul.mubr.f32.gmra.mrb[28].mxu0 %v2002_v17  ;;  %v1460_v35 = vpop.eup %1459  ;;  %v748_v42 = vmul.f32 %v1458_v13, %v1878_v61 }
 0x196   :  { %v514_v27 = vadd.f32 %v513_v39, %v1907_v25  ;;  %v767_v15 = vmul.f32 %v735_v11, %v478_v58  ;;  %v1462_v59 = vpop.eup %1461  ;;  %v749_v62 = vmul.f32 %v1460_v35, %v1884_v4  ;;  %v1470_v11 = vld [vmem:[#allocation3 + $0x28] sm:$0xff] }
 0x197   :  { %v778_v36 = vmul.f32 %v746_v54, %v512_v29  ;;  %v1464_v17 = vpop.eup %1463  ;;  %v750_v2 = vmul.f32 %v1462_v59, %v1903_v21 }
 0x198   :  { %v779_v34 = vmul.f32 %v747_v37, %v514_v27  ;;  %v517_v55 = vpop.f32.mrb[44].mxu1  ;;  %931 = vmatprep.mubr.f32.mxu0 %v767_v15  ;;  %v751_v32 = vmul.f32 %v1464_v17, %v1910_v30  ;;  %v1471_v15 = vld [vmem:[#allocation3 + $0x30] sm:$0xff] }
 0x199   :  { %v518_v45 = vadd.f32 %v517_v55, %v1899_v19  ;;  %v519_v14 = vpop.f32.mrb[45].mxu1  ;;  %932 = vmatmul.mubr.f32.gmra.mrb[30].mxu0 %v766_v22 }
 0x19a   :  { %v520_v48 = vadd.f32 %v519_v14, %v1907_v25  ;;  %936 = vmatprep.mubr.f32.mxu0 %v2004_v6  ;;  %v1472_v14 = vld [vmem:[#allocation3 + $0x38] sm:$0xff] }
 0x19b   :  { %v780_v16 = vmul.f32 %v748_v42, %v518_v45 }
 0x19c   :  { %v781_v60 = vmul.f32 %v749_v62, %v520_v48  ;;  %v523_v56 = vpop.f32.mrb[46].mxu1 }
 0x19d   :  { %v524_v61 = vadd.f32 %v523_v56, %v1899_v19  ;;  %v525_v0 = vpop.f32.mrb[47].mxu1  ;;  %937 = vmatmul.mubr.f32.gmra.mrb[32].mxu0 %v2000_v50 }
 0x19e   :  { %v526_v4 = vadd.f32 %v525_v0, %v1907_v25  ;;  %941 = vmatprep.mubr.f32.mxu0 %v2014_v10  ;;  %v2068_v25 = vld [vmem:[%s2107_s6] ss:$0 sm:$0xff]  ;;  %s1608_s6 = smov [#allocation11]  }
 0x19f   :  { %v782_v3 = vmul.f32 %v750_v2, %v524_v61  ;;  %v1465_v10 = vld [vmem:[#allocation3] sm:$0xff]  ;;  %s1088_s8 = sshll.u32 %s1608_s6, 4  ;;  %s1089_s8 = int_to_ptr.vmem [resolvable:$true] %s1088_s8 }
 0x1a0   :  { %v783_v28 = vmul.f32 %v751_v32, %v526_v4  ;;  %v1474_v4 = vld [vmem:[#allocation3 + $0x48] sm:$0xff]  ;;  %s1569_s9 = scalar_lea.vmem %s1089_s8, 2048  ;;  %p1574_p5 = scmp.lt.s32.totalorder %s1089_s8, %s1089_s8 }
 0x1a1   :  { %942 = vmatmul.mubr.f32.gmra.mrb[34].mxu0 %v2012_v44  ;;  %p1570_p4 = scmp.ne.s32.totalorder %s1089_s8, %s1569_s9  ;;  %p1575_p6 = scmp.lt.s32.totalorder %s1569_s9, %s1569_s9 }
 0x1a2   :  { %946 = vmatprep.mubr.f32.mxu0 %v2024_v47 }
 0x1a3   :  { %p1576_p7 = por %p1575_p6, %p1574_p5 }
 0x1a5   :  { %947 = vmatmul.mubr.f32.gmra.mrb[36].mxu0 %v2022_v40  ;;  %p1577_p8 = pnand %p1576_p7, %p1570_p4 }
 0x1a6   :  { %951 = vmatprep.mubr.f32.mxu0 %v775_v7 }
 0x1a9   :  { %952 = vmatmul.mubr.f32.gmra.mrb[38].mxu0 %v2032_v46  ;;  %v1466_v46 = vld [vmem:[#allocation3 + $0x8] sm:$0xff] }
 0x1aa   :  { %956 = vmatprep.mubr.f32.mxu0 %v777_v38 }
 0x1ad   :  { %957 = vmatmul.mubr.f32.gmra.mrb[40].mxu0 %v776_v26 }
 0x1ae   :  { %961 = vmatprep.mubr.f32.mxu0 %v779_v34 }
 0x1b1   :  { %962 = vmatmul.mubr.f32.gmra.mrb[42].mxu0 %v778_v36 }
 0x1b2   :  { %966 = vmatprep.mubr.f32.mxu0 %v781_v60  ;;  %v1473_v60 = vld [vmem:[#allocation3 + $0x40] sm:$0xff] }
 0x1b5   :  { %967 = vmatmul.mubr.f32.gmra.mrb[44].mxu0 %v780_v16 }
 0x1b6   :  { %971 = vmatprep.mubr.f32.mxu0 %v783_v28 }
 0x1b9   :  { %972 = vmatmul.mubr.f32.gmra.mrb[46].mxu0 %v782_v3 }
 0x23a   :  { %v1167_v19 = vpop.f32.mrb[16].mxu0 }
 0x23b   :  { %v1168_v21 = vpop.f32.mrb[17].mxu0 }
 0x23c   :  { %v1169_v30 = vadd.f32 %v1168_v21, %v1167_v19 }
 0x23e   :  { %v1035_v50 = vadd.f32 %v1169_v30, %v2068_v25  ;;  %v1170_v6 = vpop.f32.mrb[18].mxu0 }
 0x23f   :  { %v1171_v44 = vpop.f32.mrb[19].mxu0 }
 0x240   :  { %v1051_v40 = vadd.f32 %v1465_v10, %v1035_v50  ;;  %v1172_v47 = vadd.f32 %v1171_v44, %v1170_v6  ;;  %v1475_v50 = vld [vmem:[#allocation3 + $0x50] sm:$0xff] }
 0x242   :  { %1067 = vst [vmem:[#allocation11] sm:$0xff] %v1051_v40  ;;  %v1036_v57 = vadd.f32 %v1172_v47, %v2068_v25  ;;  %v1173_v8 = vpop.f32.mrb[20].mxu0 }
 0x243   :  { %v1174_v18 = vpop.f32.mrb[21].mxu0 }
 0x244   :  { %v1052_v52 = vadd.f32 %v1466_v46, %v1036_v57  ;;  %v1175_v63 = vadd.f32 %v1174_v18, %v1173_v8  ;;  %v1476_v57 = vld [vmem:[#allocation3 + $0x58] sm:$0xff] }
 0x246   :  { %1068 = vst [vmem:[#allocation11 + $0x8] sm:$0xff] %v1052_v52  ;;  %v1037_v7 = vadd.f32 %v1175_v63, %v2068_v25 }
 0x248   :  { %v1053_v20 = vadd.f32 %v1467_v43, %v1037_v7  ;;  %v1477_v7 = vld [vmem:[#allocation3 + $0x60] sm:$0xff] }
 0x24a   :  { %1069 = vst [vmem:[#allocation11 + $0x10] sm:$0xff] %v1053_v20 }
 0x24f   :  { %v1176_v23 = vpop.f32.mrb[22].mxu0 }
 0x250   :  { %v1177_v12 = vpop.f32.mrb[23].mxu0 }
 0x251   :  { %v1178_v1 = vadd.f32 %v1177_v12, %v1176_v23 }
 0x253   :  { %v1038_v53 = vadd.f32 %v1178_v1, %v2068_v25  ;;  %v1179_v9 = vpop.f32.mrb[24].mxu0 }
 0x254   :  { %v1180_v5 = vpop.f32.mrb[25].mxu0 }
 0x255   :  { %v1054_v51 = vadd.f32 %v1468_v31, %v1038_v53  ;;  %v1181_v24 = vadd.f32 %v1180_v5, %v1179_v9  ;;  %v1478_v53 = vld [vmem:[#allocation3 + $0x68] sm:$0xff] }
 0x257   :  { %1070 = vst [vmem:[#allocation11 + $0x18] sm:$0xff] %v1054_v51  ;;  %v1039_v33 = vadd.f32 %v1181_v24, %v2068_v25  ;;  %v1182_v58 = vpop.f32.mrb[26].mxu0 }
 0x258   :  { %v1183_v26 = vpop.f32.mrb[27].mxu0 }
 0x259   :  { %v1055_v38 = vadd.f32 %v1469_v41, %v1039_v33  ;;  %v1184_v49 = vadd.f32 %v1183_v26, %v1182_v58  ;;  %v1479_v33 = vld [vmem:[#allocation3 + $0x70] sm:$0xff] }
 0x25b   :  { %1071 = vst [vmem:[#allocation11 + $0x20] sm:$0xff] %v1055_v38  ;;  %v1040_v54 = vadd.f32 %v1184_v49, %v2068_v25  ;;  %v1480_v38 = vld [vmem:[#allocation3 + $0x78] sm:$0xff] }
 0x25d   :  { %v1056_v22 = vadd.f32 %v1470_v11, %v1040_v54 }
 0x25f   :  { %1072 = vst [vmem:[#allocation11 + $0x28] sm:$0xff] %v1056_v22 }
 0x268   :  { %v1185_v29 = vpop.f32.mrb[28].mxu0 }
 0x269   :  { %v1186_v39 = vpop.f32.mrb[29].mxu0 }
 0x26a   :  { %v1187_v13 = vadd.f32 %v1186_v39, %v1185_v29 }
 0x26c   :  { %v1041_v37 = vadd.f32 %v1187_v13, %v2068_v25  ;;  %v1188_v27 = vpop.f32.mrb[30].mxu0 }
 0x26d   :  { %v1189_v35 = vpop.f32.mrb[31].mxu0 }
 0x26e   :  { %v1057_v36 = vadd.f32 %v1471_v15, %v1041_v37  ;;  %v1190_v34 = vadd.f32 %v1189_v35, %v1188_v27 }
 0x270   :  { %1073 = vst [vmem:[#allocation11 + $0x30] sm:$0xff] %v1057_v36  ;;  %v1042_v55 = vadd.f32 %v1190_v34, %v2068_v25  ;;  %v1191_v42 = vpop.f32.mrb[32].mxu0 }
 0x271   :  { %v1192_v45 = vpop.f32.mrb[33].mxu0 }
 0x272   :  { %v1058_v59 = vadd.f32 %v1472_v14, %v1042_v55  ;;  %v1193_v62 = vadd.f32 %v1192_v45, %v1191_v42 }
 0x274   :  { %1074 = vst [vmem:[#allocation11 + $0x38] sm:$0xff] %v1058_v59  ;;  %v1043_v48 = vadd.f32 %v1193_v62, %v2068_v25  ;;  %v1194_v17 = vpop.f32.mrb[34].mxu0 }
 0x275   :  { %v1195_v16 = vpop.f32.mrb[35].mxu0 }
 0x276   :  { %v1059_v56 = vadd.f32 %v1473_v60, %v1043_v48  ;;  %v1196_v2 = vadd.f32 %v1195_v16, %v1194_v17 }
 0x278   :  { %1075 = vst [vmem:[#allocation11 + $0x40] sm:$0xff] %v1059_v56  ;;  %v1044_v61 = vadd.f32 %v1196_v2, %v2068_v25  ;;  %v1197_v0 = vpop.f32.mrb[36].mxu0 }
 0x279   :  { %v1198_v32 = vpop.f32.mrb[37].mxu0 }
 0x27a   :  { %v1060_v3 = vadd.f32 %v1474_v4, %v1044_v61  ;;  %v1199_v28 = vadd.f32 %v1198_v32, %v1197_v0 }
 0x27c   :  { %1076 = vst [vmem:[#allocation11 + $0x48] sm:$0xff] %v1060_v3  ;;  %v1045_v19 = vadd.f32 %v1199_v28, %v2068_v25  ;;  %v1200_v21 = vpop.f32.mrb[38].mxu0 }
 0x27d   :  { %v1201_v30 = vpop.f32.mrb[39].mxu0 }
 0x27e   :  { %v1061_v6 = vadd.f32 %v1475_v50, %v1045_v19  ;;  %v1202_v44 = vadd.f32 %v1201_v30, %v1200_v21 }
 0x280   :  { %1077 = vst [vmem:[#allocation11 + $0x50] sm:$0xff] %v1061_v6  ;;  %v1046_v10 = vadd.f32 %v1202_v44, %v2068_v25  ;;  %v1203_v40 = vpop.f32.mrb[40].mxu0 }
 0x281   :  { %v1204_v47 = vpop.f32.mrb[41].mxu0 }
 0x282   :  { %v1062_v8 = vadd.f32 %v1476_v57, %v1046_v10  ;;  %v1205_v18 = vadd.f32 %v1204_v47, %v1203_v40 }
 0x284   :  { %1078 = vst [vmem:[#allocation11 + $0x58] sm:$0xff] %v1062_v8  ;;  %v1047_v46 = vadd.f32 %v1205_v18, %v2068_v25  ;;  %v1206_v52 = vpop.f32.mrb[42].mxu0 }
 0x285   :  { %v1207_v63 = vpop.f32.mrb[43].mxu0 }
 0x286   :  { %v1063_v43 = vadd.f32 %v1477_v7, %v1047_v46  ;;  %v1208_v20 = vadd.f32 %v1207_v63, %v1206_v52 }
 0x288   :  { %1079 = vst [vmem:[#allocation11 + $0x60] sm:$0xff] %v1063_v43  ;;  %v1048_v23 = vadd.f32 %v1208_v20, %v2068_v25  ;;  %v1209_v12 = vpop.f32.mrb[44].mxu0 }
 0x289   :  { %v1210_v1 = vpop.f32.mrb[45].mxu0 }
 0x28a   :  { %v1064_v9 = vadd.f32 %v1478_v53, %v1048_v23  ;;  %v1211_v5 = vadd.f32 %v1210_v1, %v1209_v12 }
 0x28c   :  { %1080 = vst [vmem:[#allocation11 + $0x68] sm:$0xff] %v1064_v9  ;;  %v1049_v31 = vadd.f32 %v1211_v5, %v2068_v25  ;;  %v1212_v51 = vpop.f32.mrb[46].mxu0 }
 0x28d   :  { %v1213_v24 = vpop.f32.mrb[47].mxu0 }
 0x28e   :  { %v1065_v58 = vadd.f32 %v1479_v33, %v1049_v31  ;;  %v1214_v26 = vadd.f32 %v1213_v24, %v1212_v51 }
 0x290   :  { %1081 = vst [vmem:[#allocation11 + $0x70] sm:$0xff] %v1065_v58  ;;  %v1050_v41 = vadd.f32 %v1214_v26, %v2068_v25 }
 0x292   :  { %v1066_v49 = vadd.f32 %v1480_v38, %v1050_v41 }
 0x294   :  { %1082 = vst [vmem:[#allocation11 + $0x78] sm:$0xff] %v1066_v49 }
 0x295   :  { %1580 = shalt.err (!%p1577_p8)
}
 0x296   :  { %s1581_s14 = scalar_lea.hbm %s2108_s7, 2048 }
 0x297   :  { %p1582_p9 = scmp.ne.s32.totalorder %s2108_s7, %s1581_s14  ;;  %p1585_p10 = scmp.lt.u32.totalorder %s1581_s14, %s2108_s7 }
 0x299   :  { %p1587_p11 = pnand %p1585_p10, %p1582_p9 }
 0x29b   :  { %1590 = shalt.err (!%p1587_p11)
}
 0x29c   :  { %1094 = dma.vmem_to_hbm [thread:$0]  %s1089_s8, 2048, %s2108_s7, [#allocation5], %s1603_s1, %s1603_s1, %s1604_s25  }
 0x29d   :  { %1597 = dma.done.wait [#allocation5], 2048  }
 0x29e   :  { %1598 = vsyncadd [#allocation5], 4294965248 }
 0x29f   :  { %1098 = vsyncpa [#allocation4], 1 }
 0x2a0   :  { %1099 = vsyncpa [#allocation7], 1 }
 0x2a1   :  { %1100 = vsyncpa [#allocation10], 1 }
 0x2a2   :  { %1101 = vsyncpa [#allocation5], 1 }

// kernel: tpu_custom_call.1
= control target key start
LH: loop header
LB: loop body
LE: loop exit
PB: predicated region body
PF: predicated region fallthrough
CT: control target
= control target key end

     0   :  { %12 = vsyncpa [#allocation4], 0  ;;  %s2101_s0 = inlined_call_operand.hbm [shape: f32[128,128], index: 0, kind: input, shape index: {}]   ;;  %s2102_s1 = inlined_call_operand.hbm [shape: f32[128,256], index: 1, kind: input, shape index: {}]   ;;  %s2103_s2 = inlined_call_operand.vmem [shape: f32[1,256], index: 2, kind: input, shape index: {}]   ;;  %s2104_s3 = inlined_call_operand.hbm [shape: f32[128,256], index: 3, kind: input, shape index: {}]   ;;  %s2105_s4 = inlined_call_operand.vmem [shape: f32[1,256], index: 4, kind: input, shape index: {}]   ;;  %s2106_s5 = inlined_call_operand.hbm [shape: f32[256,128], index: 5, kind: input, shape index: {}]   ;;  %s2107_s6 = inlined_call_operand.vmem [shape: f32[1,128], index: 6, kind: input, shape index: {}]   ;;  %s2108_s7 = inlined_call_operand.hbm [shape: f32[128,128], index: 7, kind: output, shape index: {}]  }
   0x1   :  { %13 = vsyncpa [#allocation7], 0 }
   0x2   :  { %14 = vsyncpa [#allocation10], 0 }
   0x3   :  { %15 = vsyncpa [#allocation5], 0  ;;  %s1599_s24 = smov [#allocation6]   ;;  %s1481_s28 = scalar_lea.hbm %s2102_s1, 4096 }
   0x4   :  { %s33_s25 = sshll.u32 %s1599_s24, 4  ;;  %p1482_p0 = scmp.ne.s32.totalorder %s2102_s1, %s1481_s28  ;;  %s34_s25 = int_to_ptr.vmem [resolvable:$true] %s33_s25 }
   0x5   :  { %p1485_p1 = scmp.lt.u32.totalorder %s1481_s28, %s2102_s1 }
   0x7   :  { %p1487_p2 = pnand %p1485_p1, %p1482_p0 }
   0x9   :  { %1490 = shalt.err (!%p1487_p2)
}
   0xa   :  { %s1491_s10 = scalar_lea.vmem %s34_s25, 4096  ;;  %p1496_p4 = scmp.lt.s32.totalorder %s34_s25, %s34_s25 }
   0xb   :  { %p1492_p3 = scmp.ne.s32.totalorder %s34_s25, %s1491_s10  ;;  %p1497_p5 = scmp.lt.s32.totalorder %s1491_s10, %s1491_s10 }
   0xd   :  { %p1498_p6 = por %p1497_p5, %p1496_p4 }
   0xf   :  { %p1499_p7 = pnand %p1498_p6, %p1492_p3 }
  0x11   :  { %1502 = shalt.err (!%p1499_p7)
}
  0x12   :  { %s1600_s11 = smov 256   ;;  %s1601_s12 = smov 16  }
  0x13   :  { %39 = dma.hbm_to_vmem [thread:$0]  %s2102_s1, 4096, %s34_s25, [#allocation7], %s1600_s11, %s1600_s11, %s1601_s12  }
  0x14   :  { %s1602_s15 = smov [#allocation3]   ;;  %s1503_s19 = scalar_lea.hbm %s2101_s0, 2048 }
  0x15   :  { %s21_s16 = sshll.u32 %s1602_s15, 4  ;;  %p1504_p8 = scmp.ne.s32.totalorder %s2101_s0, %s1503_s19  ;;  %s22_s16 = int_to_ptr.vmem [resolvable:$true] %s21_s16 }
  0x16   :  { %p1507_p9 = scmp.lt.u32.totalorder %s1503_s19, %s2101_s0 }
  0x18   :  { %p1509_p10 = pnand %p1507_p9, %p1504_p8 }
  0x1a   :  { %1512 = shalt.err (!%p1509_p10)
}
  0x1b   :  { %s1513_s24 = scalar_lea.vmem %s22_s16, 2048  ;;  %p1518_p12 = scmp.lt.s32.totalorder %s22_s16, %s22_s16 }
  0x1c   :  { %p1514_p11 = scmp.ne.s32.totalorder %s22_s16, %s1513_s24  ;;  %p1519_p13 = scmp.lt.s32.totalorder %s1513_s24, %s1513_s24 }
  0x1e   :  { %p1520_p0 = por %p1519_p13, %p1518_p12 }
  0x20   :  { %p1521_p1 = pnand %p1520_p0, %p1514_p11 }
  0x22   :  { %1524 = shalt.err (!%p1521_p1)
}
  0x23   :  { %s1603_s1 = smov 128   ;;  %s1604_s25 = smov 8  }
  0x24   :  { %27 = dma.hbm_to_vmem [thread:$0]  %s2101_s0, 2048, %s22_s16, [#allocation4], %s1603_s1, %s1603_s1, %s1604_s25  }
  0x25   :  { %s1605_s28 = smov [#allocation8]   ;;  %s1606_s30 = smov [#allocation9]  }
  0x26   :  { %s47_s29 = sshll.u32 %s1605_s28, 4  ;;  %s61_s8 = sshll.u32 %s1606_s30, 4  ;;  %s48_s29 = int_to_ptr.vmem [resolvable:$true] %s47_s29  ;;  %s1679_s8 = int_to_ptr.vmem [resolvable:$true] %s61_s8 }
  0x27   :  { %s1525_s13 = scalar_lea.hbm %s2104_s3, 4096 }
  0x28   :  { %p1526_p2 = scmp.ne.s32.totalorder %s2104_s3, %s1525_s13  ;;  %p1529_p3 = scmp.lt.u32.totalorder %s1525_s13, %s2104_s3 }
  0x2a   :  { %p1531_p4 = pnand %p1529_p3, %p1526_p2 }
  0x2c   :  { %1534 = shalt.err (!%p1531_p4)
}
  0x2d   :  { %s1535_s0 = scalar_lea.vmem %s48_s29, 4096  ;;  %p1540_p6 = scmp.lt.s32.totalorder %s48_s29, %s48_s29 }
  0x2e   :  { %p1536_p5 = scmp.ne.s32.totalorder %s48_s29, %s1535_s0  ;;  %p1541_p7 = scmp.lt.s32.totalorder %s1535_s0, %s1535_s0 }
  0x30   :  { %p1542_p8 = por %p1541_p7, %p1540_p6 }
  0x32   :  { %p1543_p9 = pnand %p1542_p8, %p1536_p5 }
  0x34   :  { %1546 = shalt.err (!%p1543_p9)
}
  0x35   :  { %53 = dma.hbm_to_vmem [thread:$0]  %s2104_s3, 4096, %s48_s29, [#allocation7], %s1600_s11, %s1600_s11, %s1601_s12  }
  0x36   :  { %s1547_s22 = scalar_lea.hbm %s2106_s5, 4096 }
  0x37   :  { %p1548_p10 = scmp.ne.s32.totalorder %s2106_s5, %s1547_s22  ;;  %p1551_p11 = scmp.lt.u32.totalorder %s1547_s22, %s2106_s5 }
  0x39   :  { %p1553_p12 = pnand %p1551_p11, %p1548_p10 }
  0x3b   :  { %1556 = shalt.err (!%p1553_p12)
}
  0x3c   :  { %s1557_s28 = scalar_lea.vmem %s1679_s8, 4096  ;;  %p1562_p0 = scmp.lt.s32.totalorder %s1679_s8, %s1679_s8 }
  0x3d   :  { %p1558_p13 = scmp.ne.s32.totalorder %s1679_s8, %s1557_s28  ;;  %p1563_p1 = scmp.lt.s32.totalorder %s1557_s28, %s1557_s28 }
  0x3f   :  { %p1564_p2 = por %p1563_p1, %p1562_p0 }
  0x41   :  { %p1565_p3 = pnand %p1564_p2, %p1558_p13 }
  0x43   :  { %1568 = shalt.err (!%p1565_p3)
}
  0x44   :  { %67 = dma.hbm_to_vmem [thread:$0]  %s2106_s5, 4096, %s1679_s8, [#allocation10], %s1603_s1, %s1603_s1, %s1604_s25  }
  0x45   :  { %1591 = dma.done.wait [#allocation4], 2048  }
  0x46   :  { %1592 = vsyncadd [#allocation4], 4294965248 }
  0x47   :  { %1593 = dma.done.wait [#allocation7], 8192  }
  0x48   :  { %1594 = vsyncadd [#allocation7], 4294959104 }
  0x49   :  { %1595 = dma.done.wait [#allocation10], 4096  }
  0x4a   :  { %1596 = vsyncadd [#allocation10], 4294963200  ;;  %v1607_v0 = vmov 0.0   ;;  %v119_v1 = vld [vmem:[#allocation6 + $0x8] sm:$0xff]  ;;  %v121_v2 = vld [vmem:[#allocation6 + $0x18] sm:$0xff] }
  0x4b   :  { %226 = vmatprep.mubr.f32.mxu0 %v1607_v0  ;;  %274 = vmatprep.mubr.f32.mxu1 %v1607_v0  ;;  %v118_v3 = vld [vmem:[#allocation6] sm:$0xff]  ;;  %v1215_v4 = vpack.c.bf16 %v121_v2, %v119_v1  ;;  %v120_v5 = vld [vmem:[#allocation6 + $0x10] sm:$0xff]  ;;  %v123_v6 = vld [vmem:[#allocation6 + $0x28] sm:$0xff] }
  0x4c   :  { %v125_v7 = vld [vmem:[#allocation6 + $0x38] sm:$0xff]  ;;  %v1217_v8 = vpack.c.bf16 %v120_v5, %v118_v3  ;;  %v122_v10 = vld [vmem:[#allocation6 + $0x20] sm:$0xff]  ;;  %v124_v11 = vld [vmem:[#allocation6 + $0x30] sm:$0xff] }
  0x4d   :  { %v1219_v9 = vpack.c.bf16 %v125_v7, %v123_v6  ;;  %v127_v12 = vld [vmem:[#allocation6 + $0x48] sm:$0xff]  ;;  %1216 = vmatprep.subr.bf16.mxu0 %v1215_v4  ;;  %1311 = vmatprep.subr.bf16.mxu1 %v1215_v4  ;;  %v129_v13 = vld [vmem:[#allocation6 + $0x58] sm:$0xff]  ;;  %v1221_v14 = vpack.c.bf16 %v124_v11, %v122_v10  ;;  %v126_v16 = vld [vmem:[#allocation6 + $0x40] sm:$0xff] }
  0x4e   :  { %1218 = vmatpush1.bf16.msra.mxu0 %v1217_v8  ;;  %1319 = vmatpush1.bf16.msra.mxu1 %v1217_v8  ;;  %v1223_v15 = vpack.c.bf16 %v129_v13, %v127_v12  ;;  %v128_v17 = vld [vmem:[#allocation6 + $0x50] sm:$0xff]  ;;  %v131_v18 = vld [vmem:[#allocation6 + $0x68] sm:$0xff]  ;;  %v133_v19 = vld [vmem:[#allocation6 + $0x78] sm:$0xff] }
  0x4f   :  { %1220 = vmatprep.subr.bf16.mxu0 %v1219_v9  ;;  %1312 = vmatprep.subr.bf16.mxu1 %v1219_v9  ;;  %v1225_v20 = vpack.c.bf16 %v128_v17, %v126_v16  ;;  %v1227_v21 = vpack.c.bf16 %v133_v19, %v131_v18  ;;  %v130_v22 = vld [vmem:[#allocation6 + $0x60] sm:$0xff]  ;;  %v132_v23 = vld [vmem:[#allocation6 + $0x70] sm:$0xff]  ;;  %v135_v24 = vld [vmem:[#allocation6 + $0x88] sm:$0xff] }
  0x50   :  { %v137_v25 = vld [vmem:[#allocation6 + $0x98] sm:$0xff]  ;;  %v1229_v26 = vpack.c.bf16 %v132_v23, %v130_v22  ;;  %v134_v28 = vld [vmem:[#allocation6 + $0x80] sm:$0xff]  ;;  %v136_v29 = vld [vmem:[#allocation6 + $0x90] sm:$0xff] }
  0x51   :  { %v1231_v27 = vpack.c.bf16 %v137_v25, %v135_v24  ;;  %v139_v30 = vld [vmem:[#allocation6 + $0xa8] sm:$0xff]  ;;  %v141_v31 = vld [vmem:[#allocation6 + $0xb8] sm:$0xff]  ;;  %v1233_v32 = vpack.c.bf16 %v136_v29, %v134_v28  ;;  %v138_v34 = vld [vmem:[#allocation6 + $0xa0] sm:$0xff] }
  0x52   :  { %1222 = vmatpush1.bf16.msra.mxu0 %v1221_v14  ;;  %1320 = vmatpush1.bf16.msra.mxu1 %v1221_v14  ;;  %v1235_v33 = vpack.c.bf16 %v141_v31, %v139_v30  ;;  %v140_v35 = vld [vmem:[#allocation6 + $0xb0] sm:$0xff]  ;;  %v143_v36 = vld [vmem:[#allocation6 + $0xc8] sm:$0xff]  ;;  %v145_v37 = vld [vmem:[#allocation6 + $0xd8] sm:$0xff] }
  0x53   :  { %1224 = vmatprep.subr.bf16.mxu0 %v1223_v15  ;;  %1313 = vmatprep.subr.bf16.mxu1 %v1223_v15  ;;  %v1237_v38 = vpack.c.bf16 %v140_v35, %v138_v34  ;;  %v1239_v39 = vpack.c.bf16 %v145_v37, %v143_v36  ;;  %v142_v40 = vld [vmem:[#allocation6 + $0xc0] sm:$0xff]  ;;  %v144_v41 = vld [vmem:[#allocation6 + $0xd0] sm:$0xff]  ;;  %v147_v42 = vld [vmem:[#allocation6 + $0xe8] sm:$0xff] }
  0x54   :  { %v149_v43 = vld [vmem:[#allocation6 + $0xf8] sm:$0xff]  ;;  %v1241_v44 = vpack.c.bf16 %v144_v41, %v142_v40  ;;  %v146_v46 = vld [vmem:[#allocation6 + $0xe0] sm:$0xff]  ;;  %v148_v47 = vld [vmem:[#allocation6 + $0xf0] sm:$0xff] }
  0x55   :  { %v1243_v45 = vpack.c.bf16 %v149_v43, %v147_v42  ;;  %v324_v48 = vld [vmem:[#allocation8 + $0x8] sm:$0xff]  ;;  %v326_v49 = vld [vmem:[#allocation8 + $0x18] sm:$0xff]  ;;  %v1245_v50 = vpack.c.bf16 %v148_v47, %v146_v46  ;;  %v323_v52 = vld [vmem:[#allocation8] sm:$0xff] }
  0x56   :  { %1226 = vmatpush1.bf16.msra.mxu0 %v1225_v20  ;;  %1321 = vmatpush1.bf16.msra.mxu1 %v1225_v20  ;;  %v1247_v51 = vpack.c.bf16 %v326_v49, %v324_v48  ;;  %v325_v53 = vld [vmem:[#allocation8 + $0x10] sm:$0xff]  ;;  %v328_v54 = vld [vmem:[#allocation8 + $0x28] sm:$0xff]  ;;  %v330_v55 = vld [vmem:[#allocation8 + $0x38] sm:$0xff] }
  0x57   :  { %1228 = vmatprep.subr.bf16.mxu0 %v1227_v21  ;;  %1314 = vmatprep.subr.bf16.mxu1 %v1227_v21  ;;  %v1718_v56 = vld [vmem:[#allocation3] sm:$0xff]  ;;  %v1249_v58 = vpack.c.bf16 %v325_v53, %v323_v52  ;;  %v1251_v59 = vpack.c.bf16 %v330_v55, %v328_v54  ;;  %v329_v61 = vld [vmem:[#allocation8 + $0x30] sm:$0xff]  ;;  %v332_v62 = vld [vmem:[#allocation8 + $0x48] sm:$0xff] }
  0x58   :  { %v1720_v57 = vld [vmem:[#allocation3 + $0x40] sm:$0xff]  ;;  %v334_v63 = vld [vmem:[#allocation8 + $0x58] sm:$0xff]  ;;  %v1725_v1 = vld [vmem:[#allocation3 + $0x8] sm:$0xff] }
  0x59   :  { %v327_v60 = vld [vmem:[#allocation8 + $0x20] sm:$0xff]  ;;  %v1727_v2 = vld [vmem:[#allocation3 + $0x48] sm:$0xff]  ;;  %v1255_v4 = vpack.c.bf16 %v334_v63, %v332_v62  ;;  %v333_v6 = vld [vmem:[#allocation8 + $0x50] sm:$0xff] }
  0x5a   :  { %1230 = vmatpush1.bf16.msra.mxu0 %v1229_v26  ;;  %1322 = vmatpush1.bf16.msra.mxu1 %v1229_v26  ;;  %v1253_v3 = vpack.c.bf16 %v329_v61, %v327_v60  ;;  %v331_v5 = vld [vmem:[#allocation8 + $0x40] sm:$0xff]  ;;  %v336_v7 = vld [vmem:[#allocation8 + $0x68] sm:$0xff]  ;;  %v338_v8 = vld [vmem:[#allocation8 + $0x78] sm:$0xff] }
  0x5b   :  { %1232 = vmatprep.subr.bf16.mxu0 %v1231_v27  ;;  %1315 = vmatprep.subr.bf16.mxu1 %v1231_v27  ;;  %v1733_v9 = vld [vmem:[#allocation3 + $0x10] sm:$0xff]  ;;  %v1257_v11 = vpack.c.bf16 %v333_v6, %v331_v5  ;;  %v1259_v12 = vpack.c.bf16 %v338_v8, %v336_v7  ;;  %v335_v13 = vld [vmem:[#allocation8 + $0x60] sm:$0xff]  ;;  %v340_v15 = vld [vmem:[#allocation8 + $0x88] sm:$0xff] }
  0x5c   :  { %v1735_v10 = vld [vmem:[#allocation3 + $0x50] sm:$0xff]  ;;  %v342_v16 = vld [vmem:[#allocation8 + $0x98] sm:$0xff]  ;;  %v339_v21 = vld [vmem:[#allocation8 + $0x80] sm:$0xff] }
  0x5d   :  { %v337_v14 = vld [vmem:[#allocation8 + $0x70] sm:$0xff]  ;;  %v1741_v17 = vld [vmem:[#allocation3 + $0x18] sm:$0xff]  ;;  %v1263_v20 = vpack.c.bf16 %v342_v16, %v340_v15  ;;  %v344_v23 = vld [vmem:[#allocation8 + $0xa8] sm:$0xff] }
  0x5e   :  { %1234 = vmatpush1.bf16.msra.mxu0 %v1233_v32  ;;  %1323 = vmatpush1.bf16.msra.mxu1 %v1233_v32  ;;  %v1743_v18 = vld [vmem:[#allocation3 + $0x58] sm:$0xff]  ;;  %v1261_v19 = vpack.c.bf16 %v337_v14, %v335_v13  ;;  %v341_v22 = vld [vmem:[#allocation8 + $0x90] sm:$0xff]  ;;  %v106_v25 = vld [vmem:[#allocation3 + $0x20] sm:$0xff] }
  0x5f   :  { %1236 = vmatprep.subr.bf16.mxu0 %v1235_v33  ;;  %1316 = vmatprep.subr.bf16.mxu1 %v1235_v33  ;;  %v346_v24 = vld [vmem:[#allocation8 + $0xb8] sm:$0xff]  ;;  %v1749_v26 = vld [vmem:[#allocation3 + $0x60] sm:$0xff]  ;;  %v1265_v27 = vpack.c.bf16 %v341_v22, %v339_v21  ;;  %v345_v30 = vld [vmem:[#allocation8 + $0xb0] sm:$0xff] }
  0x60   :  { %v1267_v28 = vpack.c.bf16 %v346_v24, %v344_v23  ;;  %v343_v29 = vld [vmem:[#allocation8 + $0xa0] sm:$0xff]  ;;  %v348_v31 = vld [vmem:[#allocation8 + $0xc8] sm:$0xff]  ;;  %v350_v32 = vld [vmem:[#allocation8 + $0xd8] sm:$0xff] }
  0x61   :  { %v107_v33 = vld [vmem:[#allocation3 + $0x28] sm:$0xff]  ;;  %v1269_v35 = vpack.c.bf16 %v345_v30, %v343_v29  ;;  %v1271_v36 = vpack.c.bf16 %v350_v32, %v348_v31  ;;  %v347_v37 = vld [vmem:[#allocation8 + $0xc0] sm:$0xff]  ;;  %v354_v40 = vld [vmem:[#allocation8 + $0xf8] sm:$0xff] }
  0x62   :  { %1238 = vmatpush1.bf16.msra.mxu0 %v1237_v38  ;;  %1324 = vmatpush1.bf16.msra.mxu1 %v1237_v38  ;;  %v115_v34 = vld [vmem:[#allocation3 + $0x68] sm:$0xff]  ;;  %v349_v38 = vld [vmem:[#allocation8 + $0xd0] sm:$0xff]  ;;  %v109_v47 = vld [vmem:[#allocation3 + $0x38] sm:$0xff] }
  0x63   :  { %1240 = vmatprep.subr.bf16.mxu0 %v1239_v39  ;;  %1317 = vmatprep.subr.bf16.mxu1 %v1239_v39  ;;  %v352_v39 = vld [vmem:[#allocation8 + $0xe8] sm:$0xff]  ;;  %v108_v41 = vld [vmem:[#allocation3 + $0x30] sm:$0xff]  ;;  %v1273_v43 = vpack.c.bf16 %v349_v38, %v347_v37  ;;  %v117_v48 = vld [vmem:[#allocation3 + $0x78] sm:$0xff] }
  0x64   :  { %v116_v42 = vld [vmem:[#allocation3 + $0x70] sm:$0xff]  ;;  %v800_v53 = vld [vmem:[#allocation9] sm:$0xff]  ;;  %v801_v54 = vld [vmem:[#allocation9 + $0x8] sm:$0xff] }
  0x65   :  { %v353_v46 = vld [vmem:[#allocation8 + $0xf0] sm:$0xff]  ;;  %v1281_v55 = vpack.c.bf16 %v801_v54, %v800_v53  ;;  %v803_v60 = vld [vmem:[#allocation9 + $0x18] sm:$0xff]  ;;  %v820_v62 = vld [vmem:[#allocation9 + $0xa0] sm:$0xff] }
  0x66   :  { %1242 = vmatpush1.bf16.msra.mxu0 %v1241_v44  ;;  %1325 = vmatpush1.bf16.msra.mxu1 %v1241_v44  ;;  %v1275_v44 = vpack.c.bf16 %v354_v40, %v352_v39  ;;  %v821_v63 = vld [vmem:[#allocation9 + $0xa8] sm:$0xff]  ;;  %v823_v5 = vld [vmem:[#allocation9 + $0xb8] sm:$0xff]  ;;  %v806_v7 = vld [vmem:[#allocation9 + $0x30] sm:$0xff] }
  0x67   :  { %1244 = vmatprep.subr.bf16.mxu0 %v1243_v45  ;;  %1318 = vmatprep.subr.bf16.mxu1 %v1243_v45  ;;  %v351_v45 = vld [vmem:[#allocation8 + $0xe0] sm:$0xff]  ;;  %v807_v8 = vld [vmem:[#allocation9 + $0x38] sm:$0xff]  ;;  %v809_v14 = vld [vmem:[#allocation9 + $0x48] sm:$0xff] }
  0x68   :  { %v1277_v49 = vpack.c.bf16 %v353_v46, %v351_v45  ;;  %v808_v13 = vld [vmem:[#allocation9 + $0x40] sm:$0xff]  ;;  %v826_v16 = vld [vmem:[#allocation9 + $0xd0] sm:$0xff]  ;;  %v829_v23 = vld [vmem:[#allocation9 + $0xe8] sm:$0xff] }
  0x69   :  { %v1297_v15 = vpack.c.bf16 %v809_v14, %v808_v13  ;;  %v828_v22 = vld [vmem:[#allocation9 + $0xe0] sm:$0xff]  ;;  %v831_v29 = vld [vmem:[#allocation9 + $0xf8] sm:$0xff]  ;;  %v814_v31 = vld [vmem:[#allocation9 + $0x70] sm:$0xff] }
  0x6a   :  { %1246 = vmatpush1.bf16.msra.mxu0 %v1245_v50  ;;  %1326 = vmatpush1.bf16.msra.mxu1 %v1245_v50  ;;  %v816_v50 = vld [vmem:[#allocation9 + $0x80] sm:$0xff]  ;;  %v1303_v24 = vpack.c.bf16 %v829_v23, %v828_v22  ;;  %v815_v32 = vld [vmem:[#allocation9 + $0x78] sm:$0xff] }
  0x6b   :  { %1248 = vmatprep.subr.bf16.mxu1 %v1247_v51  ;;  %v817_v51 = vld [vmem:[#allocation9 + $0x88] sm:$0xff]  ;;  %v150_v37 = vld [vmem:[%s2103_s2] sm:$0x3] }
  0x6c   :  { %v1279_v52 = vpack.c.bf16 %v817_v51, %v816_v50 }
  0x6d   :  { %227 = vmatmul.mubr.f32.vlgmr.msra.gmra.mrb[0].mxu0 %v1718_v56  ;;  %275 = vmatmul.mubr.f32.vlgmr.msra.gmra.mrb[0].mxu1 %v1720_v57 }
  0x6e   :  { %1250 = vmatpush1.bf16.msra.mxu1 %v1249_v58  ;;  %232 = vmatprep.mubr.f32.mxu0 %v1607_v0 }
  0x6f   :  { %280 = vmatprep.mubr.f32.mxu1 %v1607_v0  ;;  %1252 = vmatprep.subr.bf16.mxu1 %v1251_v59  ;;  %v802_v59 = vld [vmem:[#allocation9 + $0x10] sm:$0xff] }
  0x70   :  { %1280 = vmatprep.subr.bf16.mxu0 %v1279_v52  ;;  %v1285_v61 = vpack.c.bf16 %v803_v60, %v802_v59 }
  0x71   :  { %233 = vmatmul.mubr.f32.gmra.mrb[2].mxu0 %v1725_v1  ;;  %281 = vmatmul.mubr.f32.gmra.mrb[2].mxu1 %v1727_v2 }
  0x72   :  { %1254 = vmatpush1.bf16.msra.mxu1 %v1253_v3  ;;  %238 = vmatprep.mubr.f32.mxu0 %v1607_v0 }
  0x73   :  { %286 = vmatprep.mubr.f32.mxu1 %v1607_v0  ;;  %1256 = vmatprep.subr.bf16.mxu1 %v1255_v4  ;;  %v822_v4 = vld [vmem:[#allocation9 + $0xb0] sm:$0xff] }
  0x74   :  { %1282 = vmatpush3.bf16.msra.mxu0 %v1281_v55  ;;  %v1291_v6 = vpack.c.bf16 %v823_v5, %v822_v4 }
  0x75   :  { %239 = vmatmul.mubr.f32.gmra.mrb[4].mxu0 %v1733_v9  ;;  %287 = vmatmul.mubr.f32.gmra.mrb[4].mxu1 %v1735_v10 }
  0x76   :  { %1258 = vmatpush1.bf16.msra.mxu1 %v1257_v11  ;;  %244 = vmatprep.mubr.f32.mxu0 %v1607_v0  ;;  %v825_v11 = vld [vmem:[#allocation9 + $0xc8] sm:$0xff] }
  0x77   :  { %292 = vmatprep.mubr.f32.mxu1 %v1607_v0  ;;  %1260 = vmatprep.subr.bf16.mxu1 %v1259_v12 }
  0x79   :  { %245 = vmatmul.mubr.f32.gmra.mrb[6].mxu0 %v1741_v17  ;;  %293 = vmatmul.mubr.f32.gmra.mrb[6].mxu1 %v1743_v18 }
  0x7a   :  { %1262 = vmatpush1.bf16.msra.mxu1 %v1261_v19  ;;  %250 = vmatprep.mubr.f32.mxu0 %v1607_v0  ;;  %v810_v19 = vld [vmem:[#allocation9 + $0x50] sm:$0xff] }
  0x7b   :  { %298 = vmatprep.mubr.f32.mxu1 %v1607_v0  ;;  %1264 = vmatprep.subr.bf16.mxu1 %v1263_v20  ;;  %v811_v20 = vld [vmem:[#allocation9 + $0x58] sm:$0xff] }
  0x7c   :  { %v1301_v21 = vpack.c.bf16 %v811_v20, %v810_v19 }
  0x7d   :  { %251 = vmatmul.mubr.f32.gmra.mrb[8].mxu0 %v106_v25  ;;  %299 = vmatmul.mubr.f32.gmra.mrb[8].mxu1 %v1749_v26 }
  0x7e   :  { %1266 = vmatpush1.bf16.msra.mxu1 %v1265_v27  ;;  %256 = vmatprep.mubr.f32.mxu0 %v1607_v0 }
  0x7f   :  { %304 = vmatprep.mubr.f32.mxu1 %v1607_v0  ;;  %1268 = vmatprep.subr.bf16.mxu1 %v1267_v28  ;;  %v830_v28 = vld [vmem:[#allocation9 + $0xf0] sm:$0xff] }
  0x80   :  { %v1307_v30 = vpack.c.bf16 %v831_v29, %v830_v28 }
  0x81   :  { %257 = vmatmul.mubr.f32.gmra.mrb[10].mxu0 %v107_v33  ;;  %305 = vmatmul.mubr.f32.gmra.mrb[10].mxu1 %v115_v34 }
  0x82   :  { %1270 = vmatpush1.bf16.msra.mxu1 %v1269_v35  ;;  %262 = vmatprep.mubr.f32.mxu0 %v1607_v0 }
  0x83   :  { %310 = vmatprep.mubr.f32.mxu1 %v1607_v0  ;;  %1272 = vmatprep.subr.bf16.mxu1 %v1271_v36 }
  0x85   :  { %263 = vmatmul.mubr.f32.gmra.mrb[12].mxu0 %v108_v41  ;;  %311 = vmatmul.mubr.f32.gmra.mrb[12].mxu1 %v116_v42 }
  0x86   :  { %1274 = vmatpush1.bf16.msra.mxu1 %v1273_v43  ;;  %268 = vmatprep.mubr.f32.mxu0 %v1607_v0 }
  0x87   :  { %316 = vmatprep.mubr.f32.mxu1 %v1607_v0  ;;  %1276 = vmatprep.subr.bf16.mxu1 %v1275_v44 }
  0x89   :  { %269 = vmatmul.mubr.f32.gmra.mrb[14].mxu0 %v109_v47  ;;  %317 = vmatmul.mubr.f32.gmra.mrb[14].mxu1 %v117_v48 }
  0x8a   :  { %1278 = vmatpush1.bf16.msra.mxu1 %v1277_v49  ;;  %431 = vmatprep.mubr.f32.mxu1 %v1607_v0 }
  0x8d   :  { %432 = vmatmul.mubr.f32.vlgmr.msra.gmra.mrb[16].mxu1 %v1718_v56  ;;  %v818_v56 = vld [vmem:[#allocation9 + $0x90] sm:$0xff] }
  0x8e   :  { %437 = vmatprep.mubr.f32.mxu1 %v1607_v0 }
  0x91   :  { %438 = vmatmul.mubr.f32.gmra.mrb[18].mxu1 %v1725_v1  ;;  %v804_v1 = vld [vmem:[#allocation9 + $0x20] sm:$0xff] }
  0x92   :  { %443 = vmatprep.mubr.f32.mxu1 %v1607_v0 }
  0x95   :  { %444 = vmatmul.mubr.f32.gmra.mrb[20].mxu1 %v1733_v9  ;;  %v1293_v9 = vpack.c.bf16 %v807_v8, %v806_v7 }
  0x96   :  { %449 = vmatprep.mubr.f32.mxu1 %v1607_v0 }
  0x99   :  { %450 = vmatmul.mubr.f32.gmra.mrb[22].mxu1 %v1741_v17  ;;  %v827_v17 = vld [vmem:[#allocation9 + $0xd8] sm:$0xff] }
  0x9a   :  { %455 = vmatprep.mubr.f32.mxu1 %v1607_v0 }
  0x9d   :  { %456 = vmatmul.mubr.f32.gmra.mrb[24].mxu1 %v106_v25  ;;  %v812_v25 = vld [vmem:[#allocation9 + $0x60] sm:$0xff] }
  0x9e   :  { %461 = vmatprep.mubr.f32.mxu1 %v1607_v0 }
  0xa1   :  { %462 = vmatmul.mubr.f32.gmra.mrb[26].mxu1 %v107_v33  ;;  %v1309_v33 = vpack.c.bf16 %v815_v32, %v814_v31 }
  0xa2   :  { %467 = vmatprep.mubr.f32.mxu1 %v1607_v0 }
  0xa5   :  { %468 = vmatmul.mubr.f32.gmra.mrb[28].mxu1 %v108_v41 }
  0xa6   :  { %473 = vmatprep.mubr.f32.mxu1 %v1607_v0 }
  0xa9   :  { %474 = vmatmul.mubr.f32.gmra.mrb[30].mxu1 %v109_v47 }
  0xaa   :  { %479 = vmatprep.mubr.f32.mxu1 %v1607_v0 }
  0xad   :  { %480 = vmatmul.mubr.f32.gmra.mrb[32].mxu1 %v1720_v57  ;;  %v819_v57 = vld [vmem:[#allocation9 + $0x98] sm:$0xff] }
  0xae   :  { %485 = vmatprep.mubr.f32.mxu1 %v1607_v0  ;;  %v1283_v58 = vpack.c.bf16 %v819_v57, %v818_v56 }
  0xb0   :  { %1284 = vmatprep.subr.bf16.mxu0 %v1283_v58 }
  0xb1   :  { %486 = vmatmul.mubr.f32.gmra.mrb[34].mxu1 %v1727_v2  ;;  %1286 = vmatpush3.bf16.msra.mxu0 %v1285_v61  ;;  %v805_v2 = vld [vmem:[#allocation9 + $0x28] sm:$0xff] }
  0xb2   :  { %491 = vmatprep.mubr.f32.mxu1 %v1607_v0  ;;  %v1289_v3 = vpack.c.bf16 %v805_v2, %v804_v1 }
  0xb5   :  { %492 = vmatmul.mubr.f32.gmra.mrb[36].mxu1 %v1735_v10  ;;  %v824_v10 = vld [vmem:[#allocation9 + $0xc0] sm:$0xff] }
  0xb6   :  { %497 = vmatprep.mubr.f32.mxu1 %v1607_v0  ;;  %v1295_v12 = vpack.c.bf16 %v825_v11, %v824_v10 }
  0xb9   :  { %498 = vmatmul.mubr.f32.gmra.mrb[38].mxu1 %v1743_v18  ;;  %v1299_v18 = vpack.c.bf16 %v827_v17, %v826_v16 }
  0xba   :  { %503 = vmatprep.mubr.f32.mxu1 %v1607_v0 }
  0xbd   :  { %504 = vmatmul.mubr.f32.gmra.mrb[40].mxu1 %v1749_v26  ;;  %v813_v26 = vld [vmem:[#allocation9 + $0x68] sm:$0xff] }
  0xbe   :  { %509 = vmatprep.mubr.f32.mxu1 %v1607_v0  ;;  %v1305_v27 = vpack.c.bf16 %v813_v26, %v812_v25 }
  0xc1   :  { %510 = vmatmul.mubr.f32.gmra.mrb[42].mxu1 %v115_v34  ;;  %v152_v34 = vlaneseq }
  0xc2   :  { %515 = vmatprep.mubr.f32.mxu1 %v1607_v0 }
  0xc3   :  { %v1784_v35 = vshrl.u32 %v152_v34, 7 }
  0xc5   :  { %516 = vmatmul.mubr.f32.gmra.mrb[44].mxu1 %v116_v42  ;;  %v154_v36 = vsub.s32 0, %v1784_v35  ;;  %v158_v38 = vsub.s32 1, %v1784_v35 }
  0xc6   :  { %521 = vmatprep.mubr.f32.mxu1 %v1607_v0  ;;  %v1287_v0 = vpack.c.bf16 %v821_v63, %v820_v62 }
  0xc7   :  { %v1793_v39 = vrot.slane %v150_v37, %v154_v36  ;;  %v1797_v40 = vrot.slane %v150_v37, %v158_v38 }
  0xc8   :  { %1288 = vmatprep.subr.bf16.mxu0 %v1287_v0 }
  0xc9   :  { %522 = vmatmul.mubr.f32.gmra.mrb[46].mxu1 %v117_v48  ;;  %1290 = vmatpush3.bf16.msra.mxu0 %v1289_v3 }
  0xca   :  { %1292 = vmatprep.subr.bf16.mxu0 %v1291_v6 }
  0xcd   :  { %1294 = vmatpush3.bf16.msra.mxu0 %v1293_v9 }
  0xce   :  { %1296 = vmatprep.subr.bf16.mxu0 %v1295_v12 }
  0xd1   :  { %1298 = vmatpush3.bf16.msra.mxu0 %v1297_v15 }
  0xd2   :  { %1300 = vmatprep.subr.bf16.mxu0 %v1299_v18 }
  0xd5   :  { %1302 = vmatpush3.bf16.msra.mxu0 %v1301_v21 }
  0xd6   :  { %1304 = vmatprep.subr.bf16.mxu0 %v1303_v24 }
  0xd9   :  { %1306 = vmatpush3.bf16.msra.mxu0 %v1305_v27 }
  0xda   :  { %1308 = vmatprep.subr.bf16.mxu0 %v1307_v30 }
  0xdd   :  { %1310 = vmatpush3.bf16.msra.mxu0 %v1309_v33 }
 0x140   :  { %v228_v41 = vpop.f32.mrb[0].mxu0  ;;  %v276_v42 = vpop.f32.mrb[0].mxu1 }
 0x141   :  { %v1800_v43 = vadd.f32 %v228_v41, %v1793_v39  ;;  %v230_v44 = vpop.f32.mrb[1].mxu0  ;;  %v278_v45 = vpop.f32.mrb[1].mxu1  ;;  %v1822_v63 = vadd.f32 %v276_v42, %v1793_v39 }
 0x142   :  { %v1803_v46 = vadd.f32 %v230_v44, %v1797_v40  ;;  %v1828_v1 = vadd.f32 %v278_v45, %v1797_v40 }
 0x143   :  { %v1102_v47 = vmul.f32 -1.442695, %v1800_v43  ;;  %v1118_v10 = vmul.f32 -1.442695, %v1822_v63 }
 0x144   :  { %v1103_v48 = vmul.f32 -1.442695, %v1803_v46  ;;  %v234_v49 = vpop.f32.mrb[2].mxu0  ;;  %v282_v50 = vpop.f32.mrb[2].mxu1  ;;  %v1119_v14 = vmul.f32 -1.442695, %v1828_v1 }
 0x145   :  { %1337 = vpow2.f32 %v1102_v47  ;;  %v1808_v51 = vadd.f32 %v234_v49, %v1793_v39  ;;  %v236_v52 = vpop.f32.mrb[3].mxu0  ;;  %v284_v53 = vpop.f32.mrb[3].mxu1  ;;  %v1840_v11 = vadd.f32 %v282_v50, %v1793_v39 }
 0x146   :  { %v1811_v54 = vadd.f32 %v236_v52, %v1797_v40  ;;  %1339 = vpow2.f32 %v1103_v48  ;;  %v1847_v15 = vadd.f32 %v284_v53, %v1797_v40 }
 0x147   :  { %v1104_v55 = vmul.f32 -1.442695, %v1808_v51  ;;  %v1120_v23 = vmul.f32 -1.442695, %v1840_v11 }
 0x148   :  { %v1105_v56 = vmul.f32 -1.442695, %v1811_v54  ;;  %v240_v57 = vpop.f32.mrb[4].mxu0  ;;  %v288_v58 = vpop.f32.mrb[4].mxu1  ;;  %v1121_v27 = vmul.f32 -1.442695, %v1847_v15 }
 0x149   :  { %1341 = vpow2.f32 %v1104_v55  ;;  %v1816_v59 = vadd.f32 %v240_v57, %v1793_v39  ;;  %v1819_v60 = vadd.f32 %v288_v58, %v1793_v39  ;;  %v242_v61 = vpop.f32.mrb[5].mxu0  ;;  %v290_v62 = vpop.f32.mrb[5].mxu1 }
 0x14a   :  { %v1825_v0 = vadd.f32 %v242_v61, %v1797_v40  ;;  %1343 = vpow2.f32 %v1105_v56  ;;  %v1856_v28 = vadd.f32 %v290_v62, %v1797_v40 }
 0x14b   :  { %v1106_v2 = vmul.f32 -1.442695, %v1816_v59  ;;  %v1122_v41 = vmul.f32 -1.442695, %v1819_v60 }
 0x14c   :  { %v1107_v3 = vmul.f32 -1.442695, %v1825_v0  ;;  %v246_v4 = vpop.f32.mrb[6].mxu0  ;;  %v294_v5 = vpop.f32.mrb[6].mxu1  ;;  %v1123_v47 = vmul.f32 -1.442695, %v1856_v28 }
 0x14d   :  { %1345 = vpow2.f32 %v1106_v2  ;;  %v1833_v6 = vadd.f32 %v246_v4, %v1793_v39  ;;  %v1836_v7 = vadd.f32 %v294_v5, %v1793_v39  ;;  %v248_v8 = vpop.f32.mrb[7].mxu0  ;;  %v296_v9 = vpop.f32.mrb[7].mxu1  ;;  %v355_v2 = vld [vmem:[%s2105_s4] sm:$0x3] }
 0x14e   :  { %v1843_v12 = vadd.f32 %v296_v9, %v1797_v40  ;;  %1347 = vpow2.f32 %v1107_v3  ;;  %v1870_v50 = vadd.f32 %v248_v8, %v1797_v40 }
 0x14f   :  { %v1338_v13 = vpop.eup %1337  ;;  %v1108_v16 = vmul.f32 -1.442695, %v1833_v6 }
 0x150   :  { %v624_v17 = vadd.f32 1.0, %v1338_v13  ;;  %v252_v18 = vpop.f32.mrb[8].mxu0  ;;  %v1340_v19 = vpop.eup %1339  ;;  %v1109_v9 = vmul.f32 -1.442695, %v1870_v50 }
 0x151   :  { %1349 = vpow2.f32 %v1108_v16  ;;  %v300_v20 = vpop.f32.mrb[8].mxu1  ;;  %v254_v21 = vpop.f32.mrb[9].mxu0  ;;  %v625_v22 = vadd.f32 1.0, %v1340_v19  ;;  %v1875_v58 = vadd.f32 %v252_v18, %v1793_v39  ;;  %v1899_v19 = vrot.slane %v355_v2, %v154_v36 }
 0x152   :  { %1351 = vpow2.f32 %v1118_v10  ;;  %v1852_v24 = vadd.f32 %v300_v20, %v1793_v39  ;;  %v302_v25 = vpop.f32.mrb[9].mxu1  ;;  %v1888_v10 = vadd.f32 %v254_v21, %v1797_v40 }
 0x153   :  { %v1342_v26 = vpop.eup %1341  ;;  %1353 = vpow2.f32 %v1119_v14  ;;  %v1859_v29 = vadd.f32 %v302_v25, %v1797_v40  ;;  %v1907_v25 = vrot.slane %v355_v2, %v158_v38 }
 0x154   :  { %1355 = vrcp.f32 %v624_v17  ;;  %v626_v30 = vadd.f32 1.0, %v1342_v26  ;;  %v258_v31 = vpop.f32.mrb[10].mxu0  ;;  %v1344_v32 = vpop.eup %1343  ;;  %v1111_v36 = vmul.f32 -1.442695, %v1888_v10 }
 0x155   :  { %1357 = vrcp.f32 %v625_v22  ;;  %v306_v33 = vpop.f32.mrb[10].mxu1  ;;  %v260_v34 = vpop.f32.mrb[11].mxu0  ;;  %v627_v37 = vadd.f32 1.0, %v1344_v32  ;;  %v1893_v16 = vadd.f32 %v258_v31, %v1793_v39  ;;  %v1110_v22 = vmul.f32 -1.442695, %v1875_v58 }
 0x156   :  { %1359 = vpow2.f32 %v1120_v23  ;;  %v1863_v42 = vadd.f32 %v306_v33, %v1793_v39  ;;  %v308_v44 = vpop.f32.mrb[11].mxu1  ;;  %v1914_v32 = vadd.f32 %v260_v34, %v1797_v40 }
 0x157   :  { %v1346_v45 = vpop.eup %1345  ;;  %1361 = vpow2.f32 %v1121_v27  ;;  %v1867_v48 = vadd.f32 %v308_v44, %v1797_v40  ;;  %v1112_v38 = vmul.f32 -1.442695, %v1893_v16 }
 0x158   :  { %1363 = vrcp.f32 %v626_v30  ;;  %v628_v49 = vadd.f32 1.0, %v1346_v45  ;;  %v264_v52 = vpop.f32.mrb[12].mxu0  ;;  %v1348_v53 = vpop.eup %1347  ;;  %v1113_v2 = vmul.f32 -1.442695, %v1914_v32 }
 0x159   :  { %1365 = vrcp.f32 %v627_v37  ;;  %v312_v55 = vpop.f32.mrb[12].mxu1  ;;  %v1872_v56 = vpop.f32.mrb[13].mxu0  ;;  %v629_v57 = vadd.f32 1.0, %v1348_v53  ;;  %v1921_v53 = vadd.f32 %v264_v52, %v1793_v39 }
 0x15a   :  { %1367 = vpow2.f32 %v1122_v41  ;;  %v1878_v61 = vadd.f32 %v312_v55, %v1793_v39  ;;  %v314_v62 = vpop.f32.mrb[13].mxu1 }
 0x15b   :  { %v1350_v3 = vpop.eup %1349  ;;  %1369 = vpow2.f32 %v1123_v47  ;;  %v1884_v4 = vadd.f32 %v314_v62, %v1797_v40 }
 0x15c   :  { %v1352_v5 = vpop.eup %1351  ;;  %1371 = vrcp.f32 %v628_v49  ;;  %v630_v8 = vadd.f32 1.0, %v1350_v3  ;;  %v1890_v13 = vpop.f32.mrb[14].mxu0 }
 0x15d   :  { %v1354_v14 = vpop.eup %1353  ;;  %1373 = vrcp.f32 %v629_v57  ;;  %v318_v17 = vpop.f32.mrb[14].mxu1  ;;  %v640_v27 = vadd.f32 1.0, %v1352_v5 }
 0x15e   :  { %v1895_v18 = vpop.f32.mrb[15].mxu0  ;;  %v1356_v20 = vpop.eup %1355  ;;  %v1903_v21 = vadd.f32 %v318_v17, %v1793_v39  ;;  %1375 = vrcp.f32 %v630_v8  ;;  %v641_v35 = vadd.f32 1.0, %v1354_v14 }
 0x15f   :  { %v320_v23 = vpop.f32.mrb[15].mxu1  ;;  %v1358_v26 = vpop.eup %1357  ;;  %1377 = vpow2.f32 %v1109_v9  ;;  %v720_v41 = vmul.f32 %v1356_v20, %v1800_v43 }
 0x160   :  { %v1910_v30 = vadd.f32 %v320_v23, %v1797_v40  ;;  %v1360_v31 = vpop.eup %1359  ;;  %v433_v33 = vpop.f32.mrb[16].mxu1  ;;  %v721_v49 = vmul.f32 %v1358_v26, %v1803_v46  ;;  %1379 = vpow2.f32 %v1110_v22  ;;  %v1114_v22 = vmul.f32 -1.442695, %v1921_v53 }
 0x161   :  { %v1362_v37 = vpop.eup %1361  ;;  %v434_v44 = vadd.f32 %v433_v33, %v1899_v19  ;;  %v435_v45 = vpop.f32.mrb[17].mxu1  ;;  %1381 = vrcp.f32 %v640_v27  ;;  %v642_v57 = vadd.f32 1.0, %v1360_v31 }
 0x162   :  { %v1364_v47 = vpop.eup %1363  ;;  %v436_v34 = vadd.f32 %v435_v45, %v1907_v25  ;;  %1383 = vpow2.f32 %v1111_v36  ;;  %v643_v9 = vadd.f32 1.0, %v1362_v37 }
 0x163   :  { %v1366_v55 = vpop.eup %1365  ;;  %v752_v62 = vmul.f32 %v720_v41, %v434_v44  ;;  %1385 = vrcp.f32 %v641_v35  ;;  %v722_v46 = vmul.f32 %v1364_v47, %v1808_v51  ;;  %v1124_v51 = vmul.f32 -1.442695, %v1836_v7 }
 0x164   :  { %v1368_v43 = vpop.eup %1367  ;;  %v753_v3 = vmul.f32 %v721_v49, %v436_v34  ;;  %v439_v5 = vpop.f32.mrb[18].mxu1  ;;  %v723_v20 = vmul.f32 %v1366_v55, %v1811_v54  ;;  %1387 = vpow2.f32 %v1112_v38 }
 0x165   :  { %v1370_v8 = vpop.eup %1369  ;;  %v440_v52 = vadd.f32 %v439_v5, %v1899_v19  ;;  %v441_v14 = vpop.f32.mrb[19].mxu1  ;;  %1389 = vrcp.f32 %v642_v57  ;;  %v644_v27 = vadd.f32 1.0, %v1368_v43  ;;  %v1125_v57 = vmul.f32 -1.442695, %v1843_v12 }
 0x166   :  { %v1372_v17 = vpop.eup %1371  ;;  %v442_v23 = vadd.f32 %v441_v14, %v1907_v25  ;;  %896 = vmatprep.mubr.f32.mxu0 %v753_v3  ;;  %1391 = vpow2.f32 %v1113_v2  ;;  %v645_v45 = vadd.f32 1.0, %v1370_v8 }
 0x167   :  { %v1374_v26 = vpop.eup %1373  ;;  %v754_v31 = vmul.f32 %v722_v46, %v440_v52  ;;  %897 = vmatmul.mubr.f32.vlgmr.msra.gmra.mrb[16].mxu0 %v752_v62  ;;  %1393 = vrcp.f32 %v643_v9  ;;  %v724_v54 = vmul.f32 %v1372_v17, %v1816_v59  ;;  %v1126_v46 = vmul.f32 -1.442695, %v1852_v24 }
 0x168   :  { %v755_v36 = vmul.f32 %v723_v20, %v442_v23  ;;  %v445_v33 = vpop.f32.mrb[20].mxu1  ;;  %v1376_v37 = vpop.eup %1375  ;;  %v725_v44 = vmul.f32 %v1374_v26, %v1825_v0  ;;  %1395 = vpow2.f32 %v1114_v22  ;;  %v1950_v26 = vadd.f32 %v1872_v56, %v1797_v40 }
 0x169   :  { %v446_v41 = vadd.f32 %v445_v33, %v1899_v19  ;;  %v447_v35 = vpop.f32.mrb[21].mxu1  ;;  %v1378_v38 = vpop.eup %1377  ;;  %1397 = vrcp.f32 %v644_v27  ;;  %v726_v2 = vmul.f32 %v1376_v37, %v1833_v6  ;;  %v1127_v6 = vmul.f32 -1.442695, %v1859_v29 }
 0x16a   :  { %v448_v47 = vadd.f32 %v447_v35, %v1907_v25  ;;  %901 = vmatprep.mubr.f32.mxu0 %v755_v36  ;;  %v631_v49 = vadd.f32 1.0, %v1378_v38  ;;  %v1380_v55 = vpop.eup %1379  ;;  %1399 = vpow2.f32 %v1124_v51  ;;  %v1128_v51 = vmul.f32 -1.442695, %v1863_v42 }
 0x16b   :  { %v756_v34 = vmul.f32 %v724_v54, %v446_v41  ;;  %902 = vmatmul.mubr.f32.gmra.mrb[18].mxu0 %v754_v31  ;;  %v1936_v43 = vpop.eup %1381  ;;  %v632_v0 = vadd.f32 1.0, %v1380_v55  ;;  %v1957_v37 = vadd.f32 %v1890_v13, %v1793_v39  ;;  %v1129_v41 = vmul.f32 -1.442695, %v1867_v48 }
 0x16c   :  { %v757_v59 = vmul.f32 %v725_v44, %v448_v47  ;;  %v451_v62 = vpop.f32.mrb[22].mxu1  ;;  %1401 = vrcp.f32 %v631_v49  ;;  %v1384_v8 = vpop.eup %1383  ;;  %v1115_v44 = vmul.f32 -1.442695, %v1950_v26  ;;  %v1130_v39 = vmul.f32 -1.442695, %v1878_v61 }
 0x16d   :  { %v452_v3 = vadd.f32 %v451_v62, %v1899_v19  ;;  %v453_v5 = vpop.f32.mrb[23].mxu1  ;;  %1403 = vrcp.f32 %v645_v45  ;;  %v1941_v9 = vpop.eup %1385  ;;  %v633_v52 = vadd.f32 1.0, %v1384_v8  ;;  %v1965_v45 = vadd.f32 %v1895_v18, %v1797_v40 }
 0x16e   :  { %906 = vmatprep.mubr.f32.mxu0 %v757_v59  ;;  %1405 = vrcp.f32 %v632_v0  ;;  %v1388_v17 = vpop.eup %1387  ;;  %v454_v13 = vadd.f32 %v453_v5, %v1907_v25  ;;  %v1116_v55 = vmul.f32 -1.442695, %v1957_v37  ;;  %v1131_v62 = vmul.f32 -1.442695, %v1884_v4 }
 0x16f   :  { %v1943_v14 = vmul.f32 %v726_v2, %v452_v3  ;;  %907 = vmatmul.mubr.f32.gmra.mrb[20].mxu0 %v756_v34  ;;  %1407 = vpow2.f32 %v1125_v57  ;;  %v1946_v22 = vpop.eup %1389  ;;  %v634_v23 = vadd.f32 1.0, %v1388_v17  ;;  %v1117_v3 = vmul.f32 -1.442695, %v1965_v45 }
 0x170   :  { %v457_v20 = vpop.f32.mrb[24].mxu1  ;;  %1409 = vrcp.f32 %v633_v52  ;;  %v1392_v31 = vpop.eup %1391 }
 0x171   :  { %v459_v27 = vpop.f32.mrb[25].mxu1  ;;  %1411 = vpow2.f32 %v1126_v46  ;;  %v1953_v36 = vpop.eup %1393  ;;  %v635_v33 = vadd.f32 1.0, %v1392_v31  ;;  %v458_v40 = vadd.f32 %v457_v20, %v1899_v19  ;;  %v1133_v20 = vmul.f32 -1.442695, %v1910_v30 }
 0x172   :  { %1413 = vrcp.f32 %v634_v23  ;;  %v1396_v54 = vpop.eup %1395 }
 0x173   :  { %1415 = vpow2.f32 %v1127_v6  ;;  %v1960_v56 = vpop.eup %1397  ;;  %v636_v38 = vadd.f32 1.0, %v1396_v54  ;;  %v1132_v6 = vmul.f32 -1.442695, %v1903_v21 }
 0x174   :  { %v463_v35 = vpop.f32.mrb[26].mxu1  ;;  %1417 = vrcp.f32 %v635_v33  ;;  %v1400_v49 = vpop.eup %1399 }
 0x175   :  { %v465_v47 = vpop.f32.mrb[27].mxu1  ;;  %1419 = vpow2.f32 %v1128_v51  ;;  %v646_v0 = vadd.f32 1.0, %v1400_v49  ;;  %v464_v33 = vadd.f32 %v463_v35, %v1899_v19 }
 0x176   :  { %v1402_v34 = vpop.eup %1401  ;;  %1421 = vrcp.f32 %v636_v38 }
 0x177   :  { %v1970_v57 = vpop.eup %1403  ;;  %v727_v59 = vmul.f32 %v1402_v34, %v1870_v50  ;;  %1423 = vpow2.f32 %v1129_v41  ;;  %v460_v50 = vadd.f32 %v459_v27, %v1907_v25 }
 0x178   :  { %v469_v18 = vpop.f32.mrb[28].mxu1  ;;  %v1406_v2 = vpop.eup %1405  ;;  %1425 = vpow2.f32 %v1115_v44 }
 0x179   :  { %v1976_v5 = vpop.f32.mrb[29].mxu1  ;;  %v1408_v8 = vpop.eup %1407  ;;  %v728_v46 = vmul.f32 %v1406_v2, %v1875_v58  ;;  %1427 = vpow2.f32 %v1130_v39  ;;  %v759_v52 = vmul.f32 %v727_v59, %v454_v13 }
 0x17a   :  { %v1410_v17 = vpop.eup %1409  ;;  %1429 = vpow2.f32 %v1116_v55  ;;  %v647_v41 = vadd.f32 1.0, %v1408_v8 }
 0x17b   :  { %v1412_v23 = vpop.eup %1411  ;;  %v729_v31 = vmul.f32 %v1410_v17, %v1888_v10  ;;  %1431 = vpow2.f32 %v1131_v62  ;;  %v760_v51 = vmul.f32 %v728_v46, %v458_v40  ;;  %911 = vmatprep.mubr.f32.mxu0 %v759_v52  ;;  %v466_v10 = vadd.f32 %v465_v47, %v1907_v25 }
 0x17c   :  { %v1984_v54 = vpop.f32.mrb[30].mxu1  ;;  %v1414_v58 = vpop.eup %1413  ;;  %1433 = vpow2.f32 %v1117_v3  ;;  %912 = vmatmul.mubr.f32.gmra.mrb[22].mxu0 %v1943_v14  ;;  %v648_v13 = vadd.f32 1.0, %v1412_v23  ;;  %v470_v14 = vadd.f32 %v469_v18, %v1899_v19  ;;  %v736_v40 = vmul.f32 %v1936_v43, %v1822_v63 }
 0x17d   :  { %v1987_v27 = vpop.f32.mrb[31].mxu1  ;;  %v1416_v38 = vpop.eup %1415  ;;  %1435 = vrcp.f32 %v646_v0  ;;  %v730_v44 = vmul.f32 %v1414_v58, %v1893_v16  ;;  %v761_v49 = vmul.f32 %v729_v31, %v460_v50 }
 0x17e   :  { %v1418_v39 = vpop.eup %1417  ;;  %1437 = vpow2.f32 %v1132_v6  ;;  %v649_v16 = vadd.f32 1.0, %v1416_v38 }
 0x17f   :  { %v1420_v35 = vpop.eup %1419  ;;  %v731_v34 = vmul.f32 %v1418_v39, %v1914_v32  ;;  %1439 = vpow2.f32 %v1133_v20  ;;  %v762_v55 = vmul.f32 %v730_v44, %v464_v33  ;;  %916 = vmatprep.mubr.f32.mxu0 %v761_v49  ;;  %v737_v32 = vmul.f32 %v1941_v9, %v1828_v1 }
 0x180   :  { %v481_v59 = vpop.f32.mrb[32].mxu1  ;;  %v1422_v62 = vpop.eup %1421  ;;  %1441 = vrcp.f32 %v647_v41  ;;  %917 = vmatmul.mubr.f32.gmra.mrb[24].mxu0 %v760_v51  ;;  %v650_v52 = vadd.f32 1.0, %v1420_v35  ;;  %v738_v1 = vmul.f32 %v1946_v22, %v1840_v11  ;;  %v739_v33 = vmul.f32 %v1953_v36, %v1847_v15 }
 0x181   :  { %v482_v47 = vadd.f32 %v481_v59, %v1899_v19  ;;  %v483_v2 = vpop.f32.mrb[33].mxu1  ;;  %v1424_v0 = vpop.eup %1423  ;;  %v732_v3 = vmul.f32 %v1422_v62, %v1921_v53  ;;  %v763_v8 = vmul.f32 %v731_v34, %v466_v10  ;;  %1443 = vrcp.f32 %v648_v13 }
 0x182   :  { %v484_v18 = vadd.f32 %v483_v2, %v1907_v25  ;;  %v1426_v46 = vpop.eup %1425  ;;  %1445 = vrcp.f32 %v649_v16  ;;  %v651_v53 = vadd.f32 1.0, %v1424_v0  ;;  %v740_v35 = vmul.f32 %v1960_v56, %v1819_v60 }
 0x183   :  { %v2000_v50 = vmul.f32 %v736_v40, %v482_v47  ;;  %v1428_v63 = vpop.eup %1427  ;;  %v637_v43 = vadd.f32 1.0, %v1426_v46  ;;  %v2002_v17 = vmul.f32 %v732_v3, %v470_v14  ;;  %921 = vmatprep.mubr.f32.mxu0 %v763_v8  ;;  %v741_v14 = vmul.f32 %v1970_v57, %v1856_v28 }
 0x184   :  { %v2004_v6 = vmul.f32 %v737_v32, %v484_v18  ;;  %v487_v20 = vpop.f32.mrb[34].mxu1  ;;  %v1430_v23 = vpop.eup %1429  ;;  %922 = vmatmul.mubr.f32.gmra.mrb[26].mxu0 %v762_v55  ;;  %v652_v11 = vadd.f32 1.0, %v1428_v63  ;;  %v472_v18 = vadd.f32 %v1976_v5, %v1907_v25 }
 0x185   :  { %v488_v9 = vadd.f32 %v487_v20, %v1899_v19  ;;  %v489_v31 = vpop.f32.mrb[35].mxu1  ;;  %v1432_v51 = vpop.eup %1431  ;;  %1447 = vrcp.f32 %v637_v43  ;;  %v638_v58 = vadd.f32 1.0, %v1430_v23 }
 0x186   :  { %v490_v41 = vadd.f32 %v489_v31, %v1907_v25  ;;  %v1434_v38 = vpop.eup %1433  ;;  %1449 = vrcp.f32 %v650_v52  ;;  %v653_v15 = vadd.f32 1.0, %v1432_v51 }
 0x187   :  { %v2012_v44 = vmul.f32 %v738_v1, %v488_v9  ;;  %v1436_v49 = vpop.eup %1435  ;;  %1451 = vrcp.f32 %v638_v58  ;;  %v639_v22 = vadd.f32 1.0, %v1434_v38  ;;  %v478_v58 = vadd.f32 %v1987_v27, %v1907_v25 }
 0x188   :  { %v2014_v10 = vmul.f32 %v739_v33, %v490_v41  ;;  %v493_v39 = vpop.f32.mrb[36].mxu1  ;;  %v1438_v13 = vpop.eup %1437  ;;  %1453 = vrcp.f32 %v651_v53  ;;  %v742_v2 = vmul.f32 %v1436_v49, %v1836_v7 }
 0x189   :  { %v494_v36 = vadd.f32 %v493_v39, %v1899_v19  ;;  %v495_v34 = vpop.f32.mrb[37].mxu1  ;;  %v1440_v55 = vpop.eup %1439  ;;  %1455 = vrcp.f32 %v639_v22  ;;  %v654_v16 = vadd.f32 1.0, %v1438_v13 }
 0x18a   :  { %v496_v59 = vadd.f32 %v495_v34, %v1907_v25  ;;  %v1442_v62 = vpop.eup %1441  ;;  %1457 = vrcp.f32 %v652_v11  ;;  %v655_v0 = vadd.f32 1.0, %v1440_v55 }
 0x18b   :  { %v2022_v40 = vmul.f32 %v740_v35, %v494_v36  ;;  %v1444_v56 = vpop.eup %1443  ;;  %1459 = vrcp.f32 %v653_v15  ;;  %v743_v28 = vmul.f32 %v1442_v62, %v1843_v12  ;;  %v476_v12 = vadd.f32 %v1984_v54, %v1899_v19 }
 0x18c   :  { %v2024_v47 = vmul.f32 %v741_v14, %v496_v59  ;;  %v499_v60 = vpop.f32.mrb[38].mxu1  ;;  %v1446_v8 = vpop.eup %1445  ;;  %v744_v63 = vmul.f32 %v1444_v56, %v1852_v24  ;;  %1461 = vrcp.f32 %v654_v16 }
 0x18d   :  { %v500_v32 = vadd.f32 %v499_v60, %v1899_v19  ;;  %v501_v3 = vpop.f32.mrb[39].mxu1  ;;  %1463 = vrcp.f32 %v655_v0  ;;  %v745_v5 = vmul.f32 %v1446_v8, %v1859_v29 }
 0x18e   :  { %v502_v57 = vadd.f32 %v501_v3, %v1907_v25 }
 0x18f   :  { %v2032_v46 = vmul.f32 %v742_v2, %v500_v32  ;;  %v1448_v52 = vpop.eup %1447 }
 0x190   :  { %v775_v7 = vmul.f32 %v743_v28, %v502_v57  ;;  %v505_v43 = vpop.f32.mrb[40].mxu1  ;;  %v1450_v20 = vpop.eup %1449  ;;  %v733_v23 = vmul.f32 %v1448_v52, %v1950_v26 }
 0x191   :  { %v506_v1 = vadd.f32 %v505_v43, %v1899_v19  ;;  %v507_v53 = vpop.f32.mrb[41].mxu1  ;;  %v1452_v9 = vpop.eup %1451  ;;  %v746_v54 = vmul.f32 %v1450_v20, %v1863_v42  ;;  %v1467_v43 = vld [vmem:[#allocation3 + $0x10] sm:$0xff] }
 0x192   :  { %v508_v31 = vadd.f32 %v507_v53, %v1907_v25  ;;  %v1454_v51 = vpop.eup %1453  ;;  %v734_v24 = vmul.f32 %v1452_v9, %v1957_v37  ;;  %v765_v33 = vmul.f32 %v733_v23, %v472_v18 }
 0x193   :  { %v776_v26 = vmul.f32 %v744_v63, %v506_v1  ;;  %v1456_v41 = vpop.eup %1455  ;;  %v747_v37 = vmul.f32 %v1454_v51, %v1867_v48 }
 0x194   :  { %v777_v38 = vmul.f32 %v745_v5, %v508_v31  ;;  %v511_v49 = vpop.f32.mrb[42].mxu1  ;;  %v735_v11 = vmul.f32 %v1456_v41, %v1965_v45  ;;  %v766_v22 = vmul.f32 %v734_v24, %v476_v12  ;;  %926 = vmatprep.mubr.f32.mxu0 %v765_v33  ;;  %v1458_v13 = vpop.eup %1457  ;;  %v1468_v31 = vld [vmem:[#allocation3 + $0x18] sm:$0xff]  ;;  %v1469_v41 = vld [vmem:[#allocation3 + $0x20] sm:$0xff] }
 0x195   :  { %v512_v29 = vadd.f32 %v511_v49, %v1899_v19  ;;  %v513_v39 = vpop.f32.mrb[43].mxu1  ;;  %927 = vmatmul.mubr.f32.gmra.mrb[28].mxu0 %v2002_v17  ;;  %v1460_v35 = vpop.eup %1459  ;;  %v748_v42 = vmul.f32 %v1458_v13, %v1878_v61 }
 0x196   :  { %v514_v27 = vadd.f32 %v513_v39, %v1907_v25  ;;  %v767_v15 = vmul.f32 %v735_v11, %v478_v58  ;;  %v1462_v59 = vpop.eup %1461  ;;  %v749_v62 = vmul.f32 %v1460_v35, %v1884_v4  ;;  %v1470_v11 = vld [vmem:[#allocation3 + $0x28] sm:$0xff] }
 0x197   :  { %v778_v36 = vmul.f32 %v746_v54, %v512_v29  ;;  %v1464_v17 = vpop.eup %1463  ;;  %v750_v2 = vmul.f32 %v1462_v59, %v1903_v21 }
 0x198   :  { %v779_v34 = vmul.f32 %v747_v37, %v514_v27  ;;  %v517_v55 = vpop.f32.mrb[44].mxu1  ;;  %931 = vmatprep.mubr.f32.mxu0 %v767_v15  ;;  %v751_v32 = vmul.f32 %v1464_v17, %v1910_v30  ;;  %v1471_v15 = vld [vmem:[#allocation3 + $0x30] sm:$0xff] }
 0x199   :  { %v518_v45 = vadd.f32 %v517_v55, %v1899_v19  ;;  %v519_v14 = vpop.f32.mrb[45].mxu1  ;;  %932 = vmatmul.mubr.f32.gmra.mrb[30].mxu0 %v766_v22 }
 0x19a   :  { %v520_v48 = vadd.f32 %v519_v14, %v1907_v25  ;;  %936 = vmatprep.mubr.f32.mxu0 %v2004_v6  ;;  %v1472_v14 = vld [vmem:[#allocation3 + $0x38] sm:$0xff] }
 0x19b   :  { %v780_v16 = vmul.f32 %v748_v42, %v518_v45 }
 0x19c   :  { %v781_v60 = vmul.f32 %v749_v62, %v520_v48  ;;  %v523_v56 = vpop.f32.mrb[46].mxu1 }
 0x19d   :  { %v524_v61 = vadd.f32 %v523_v56, %v1899_v19  ;;  %v525_v0 = vpop.f32.mrb[47].mxu1  ;;  %937 = vmatmul.mubr.f32.gmra.mrb[32].mxu0 %v2000_v50 }
 0x19e   :  { %v526_v4 = vadd.f32 %v525_v0, %v1907_v25  ;;  %941 = vmatprep.mubr.f32.mxu0 %v2014_v10  ;;  %v2068_v25 = vld [vmem:[%s2107_s6] ss:$0 sm:$0xff]  ;;  %s1608_s6 = smov [#allocation11]  }
 0x19f   :  { %v782_v3 = vmul.f32 %v750_v2, %v524_v61  ;;  %v1465_v10 = vld [vmem:[#allocation3] sm:$0xff]  ;;  %s1088_s8 = sshll.u32 %s1608_s6, 4  ;;  %s1089_s8 = int_to_ptr.vmem [resolvable:$true] %s1088_s8 }
 0x1a0   :  { %v783_v28 = vmul.f32 %v751_v32, %v526_v4  ;;  %v1474_v4 = vld [vmem:[#allocation3 + $0x48] sm:$0xff]  ;;  %s1569_s9 = scalar_lea.vmem %s1089_s8, 2048  ;;  %p1574_p5 = scmp.lt.s32.totalorder %s1089_s8, %s1089_s8 }
 0x1a1   :  { %942 = vmatmul.mubr.f32.gmra.mrb[34].mxu0 %v2012_v44  ;;  %p1570_p4 = scmp.ne.s32.totalorder %s1089_s8, %s1569_s9  ;;  %p1575_p6 = scmp.lt.s32.totalorder %s1569_s9, %s1569_s9 }
 0x1a2   :  { %946 = vmatprep.mubr.f32.mxu0 %v2024_v47 }
 0x1a3   :  { %p1576_p7 = por %p1575_p6, %p1574_p5 }
 0x1a5   :  { %947 = vmatmul.mubr.f32.gmra.mrb[36].mxu0 %v2022_v40  ;;  %p1577_p8 = pnand %p1576_p7, %p1570_p4 }
 0x1a6   :  { %951 = vmatprep.mubr.f32.mxu0 %v775_v7 }
 0x1a9   :  { %952 = vmatmul.mubr.f32.gmra.mrb[38].mxu0 %v2032_v46  ;;  %v1466_v46 = vld [vmem:[#allocation3 + $0x8] sm:$0xff] }
 0x1aa   :  { %956 = vmatprep.mubr.f32.mxu0 %v777_v38 }
 0x1ad   :  { %957 = vmatmul.mubr.f32.gmra.mrb[40].mxu0 %v776_v26 }
 0x1ae   :  { %961 = vmatprep.mubr.f32.mxu0 %v779_v34 }
 0x1b1   :  { %962 = vmatmul.mubr.f32.gmra.mrb[42].mxu0 %v778_v36 }
 0x1b2   :  { %966 = vmatprep.mubr.f32.mxu0 %v781_v60  ;;  %v1473_v60 = vld [vmem:[#allocation3 + $0x40] sm:$0xff] }
 0x1b5   :  { %967 = vmatmul.mubr.f32.gmra.mrb[44].mxu0 %v780_v16 }
 0x1b6   :  { %971 = vmatprep.mubr.f32.mxu0 %v783_v28 }
 0x1b9   :  { %972 = vmatmul.mubr.f32.gmra.mrb[46].mxu0 %v782_v3 }
 0x23a   :  { %v1167_v19 = vpop.f32.mrb[16].mxu0 }
 0x23b   :  { %v1168_v21 = vpop.f32.mrb[17].mxu0 }
 0x23c   :  { %v1169_v30 = vadd.f32 %v1168_v21, %v1167_v19 }
 0x23e   :  { %v1035_v50 = vadd.f32 %v1169_v30, %v2068_v25  ;;  %v1170_v6 = vpop.f32.mrb[18].mxu0 }
 0x23f   :  { %v1171_v44 = vpop.f32.mrb[19].mxu0 }
 0x240   :  { %v1051_v40 = vadd.f32 %v1465_v10, %v1035_v50  ;;  %v1172_v47 = vadd.f32 %v1171_v44, %v1170_v6  ;;  %v1475_v50 = vld [vmem:[#allocation3 + $0x50] sm:$0xff] }
 0x242   :  { %1067 = vst [vmem:[#allocation11] sm:$0xff] %v1051_v40  ;;  %v1036_v57 = vadd.f32 %v1172_v47, %v2068_v25  ;;  %v1173_v8 = vpop.f32.mrb[20].mxu0 }
 0x243   :  { %v1174_v18 = vpop.f32.mrb[21].mxu0 }
 0x244   :  { %v1052_v52 = vadd.f32 %v1466_v46, %v1036_v57  ;;  %v1175_v63 = vadd.f32 %v1174_v18, %v1173_v8  ;;  %v1476_v57 = vld [vmem:[#allocation3 + $0x58] sm:$0xff] }
 0x246   :  { %1068 = vst [vmem:[#allocation11 + $0x8] sm:$0xff] %v1052_v52  ;;  %v1037_v7 = vadd.f32 %v1175_v63, %v2068_v25 }
 0x248   :  { %v1053_v20 = vadd.f32 %v1467_v43, %v1037_v7  ;;  %v1477_v7 = vld [vmem:[#allocation3 + $0x60] sm:$0xff] }
 0x24a   :  { %1069 = vst [vmem:[#allocation11 + $0x10] sm:$0xff] %v1053_v20 }
 0x24f   :  { %v1176_v23 = vpop.f32.mrb[22].mxu0 }
 0x250   :  { %v1177_v12 = vpop.f32.mrb[23].mxu0 }
 0x251   :  { %v1178_v1 = vadd.f32 %v1177_v12, %v1176_v23 }
 0x253   :  { %v1038_v53 = vadd.f32 %v1178_v1, %v2068_v25  ;;  %v1179_v9 = vpop.f32.mrb[24].mxu0 }
 0x254   :  { %v1180_v5 = vpop.f32.mrb[25].mxu0 }
 0x255   :  { %v1054_v51 = vadd.f32 %v1468_v31, %v1038_v53  ;;  %v1181_v24 = vadd.f32 %v1180_v5, %v1179_v9  ;;  %v1478_v53 = vld [vmem:[#allocation3 + $0x68] sm:$0xff] }
 0x257   :  { %1070 = vst [vmem:[#allocation11 + $0x18] sm:$0xff] %v1054_v51  ;;  %v1039_v33 = vadd.f32 %v1181_v24, %v2068_v25  ;;  %v1182_v58 = vpop.f32.mrb[26].mxu0 }
 0x258   :  { %v1183_v26 = vpop.f32.mrb[27].mxu0 }
 0x259   :  { %v1055_v38 = vadd.f32 %v1469_v41, %v1039_v33  ;;  %v1184_v49 = vadd.f32 %v1183_v26, %v1182_v58  ;;  %v1479_v33 = vld [vmem:[#allocation3 + $0x70] sm:$0xff] }
 0x25b   :  { %1071 = vst [vmem:[#allocation11 + $0x20] sm:$0xff] %v1055_v38  ;;  %v1040_v54 = vadd.f32 %v1184_v49, %v2068_v25  ;;  %v1480_v38 = vld [vmem:[#allocation3 + $0x78] sm:$0xff] }
 0x25d   :  { %v1056_v22 = vadd.f32 %v1470_v11, %v1040_v54 }
 0x25f   :  { %1072 = vst [vmem:[#allocation11 + $0x28] sm:$0xff] %v1056_v22 }
 0x268   :  { %v1185_v29 = vpop.f32.mrb[28].mxu0 }
 0x269   :  { %v1186_v39 = vpop.f32.mrb[29].mxu0 }
 0x26a   :  { %v1187_v13 = vadd.f32 %v1186_v39, %v1185_v29 }
 0x26c   :  { %v1041_v37 = vadd.f32 %v1187_v13, %v2068_v25  ;;  %v1188_v27 = vpop.f32.mrb[30].mxu0 }
 0x26d   :  { %v1189_v35 = vpop.f32.mrb[31].mxu0 }
 0x26e   :  { %v1057_v36 = vadd.f32 %v1471_v15, %v1041_v37  ;;  %v1190_v34 = vadd.f32 %v1189_v35, %v1188_v27 }
 0x270   :  { %1073 = vst [vmem:[#allocation11 + $0x30] sm:$0xff] %v1057_v36  ;;  %v1042_v55 = vadd.f32 %v1190_v34, %v2068_v25  ;;  %v1191_v42 = vpop.f32.mrb[32].mxu0 }
 0x271   :  { %v1192_v45 = vpop.f32.mrb[33].mxu0 }
 0x272   :  { %v1058_v59 = vadd.f32 %v1472_v14, %v1042_v55  ;;  %v1193_v62 = vadd.f32 %v1192_v45, %v1191_v42 }
 0x274   :  { %1074 = vst [vmem:[#allocation11 + $0x38] sm:$0xff] %v1058_v59  ;;  %v1043_v48 = vadd.f32 %v1193_v62, %v2068_v25  ;;  %v1194_v17 = vpop.f32.mrb[34].mxu0 }
 0x275   :  { %v1195_v16 = vpop.f32.mrb[35].mxu0 }
 0x276   :  { %v1059_v56 = vadd.f32 %v1473_v60, %v1043_v48  ;;  %v1196_v2 = vadd.f32 %v1195_v16, %v1194_v17 }
 0x278   :  { %1075 = vst [vmem:[#allocation11 + $0x40] sm:$0xff] %v1059_v56  ;;  %v1044_v61 = vadd.f32 %v1196_v2, %v2068_v25  ;;  %v1197_v0 = vpop.f32.mrb[36].mxu0 }
 0x279   :  { %v1198_v32 = vpop.f32.mrb[37].mxu0 }
 0x27a   :  { %v1060_v3 = vadd.f32 %v1474_v4, %v1044_v61  ;;  %v1199_v28 = vadd.f32 %v1198_v32, %v1197_v0 }
 0x27c   :  { %1076 = vst [vmem:[#allocation11 + $0x48] sm:$0xff] %v1060_v3  ;;  %v1045_v19 = vadd.f32 %v1199_v28, %v2068_v25  ;;  %v1200_v21 = vpop.f32.mrb[38].mxu0 }
 0x27d   :  { %v1201_v30 = vpop.f32.mrb[39].mxu0 }
 0x27e   :  { %v1061_v6 = vadd.f32 %v1475_v50, %v1045_v19  ;;  %v1202_v44 = vadd.f32 %v1201_v30, %v1200_v21 }
 0x280   :  { %1077 = vst [vmem:[#allocation11 + $0x50] sm:$0xff] %v1061_v6  ;;  %v1046_v10 = vadd.f32 %v1202_v44, %v2068_v25  ;;  %v1203_v40 = vpop.f32.mrb[40].mxu0 }
 0x281   :  { %v1204_v47 = vpop.f32.mrb[41].mxu0 }
 0x282   :  { %v1062_v8 = vadd.f32 %v1476_v57, %v1046_v10  ;;  %v1205_v18 = vadd.f32 %v1204_v47, %v1203_v40 }
 0x284   :  { %1078 = vst [vmem:[#allocation11 + $0x58] sm:$0xff] %v1062_v8  ;;  %v1047_v46 = vadd.f32 %v1205_v18, %v2068_v25  ;;  %v1206_v52 = vpop.f32.mrb[42].mxu0 }
 0x285   :  { %v1207_v63 = vpop.f32.mrb[43].mxu0 }
 0x286   :  { %v1063_v43 = vadd.f32 %v1477_v7, %v1047_v46  ;;  %v1208_v20 = vadd.f32 %v1207_v63, %v1206_v52 }
 0x288   :  { %1079 = vst [vmem:[#allocation11 + $0x60] sm:$0xff] %v1063_v43  ;;  %v1048_v23 = vadd.f32 %v1208_v20, %v2068_v25  ;;  %v1209_v12 = vpop.f32.mrb[44].mxu0 }
 0x289   :  { %v1210_v1 = vpop.f32.mrb[45].mxu0 }
 0x28a   :  { %v1064_v9 = vadd.f32 %v1478_v53, %v1048_v23  ;;  %v1211_v5 = vadd.f32 %v1210_v1, %v1209_v12 }
 0x28c   :  { %1080 = vst [vmem:[#allocation11 + $0x68] sm:$0xff] %v1064_v9  ;;  %v1049_v31 = vadd.f32 %v1211_v5, %v2068_v25  ;;  %v1212_v51 = vpop.f32.mrb[46].mxu0 }
 0x28d   :  { %v1213_v24 = vpop.f32.mrb[47].mxu0 }
 0x28e   :  { %v1065_v58 = vadd.f32 %v1479_v33, %v1049_v31  ;;  %v1214_v26 = vadd.f32 %v1213_v24, %v1212_v51 }
 0x290   :  { %1081 = vst [vmem:[#allocation11 + $0x70] sm:$0xff] %v1065_v58  ;;  %v1050_v41 = vadd.f32 %v1214_v26, %v2068_v25 }
 0x292   :  { %v1066_v49 = vadd.f32 %v1480_v38, %v1050_v41 }
 0x294   :  { %1082 = vst [vmem:[#allocation11 + $0x78] sm:$0xff] %v1066_v49 }
 0x295   :  { %1580 = shalt.err (!%p1577_p8)
}
 0x296   :  { %s1581_s14 = scalar_lea.hbm %s2108_s7, 2048 }
 0x297   :  { %p1582_p9 = scmp.ne.s32.totalorder %s2108_s7, %s1581_s14  ;;  %p1585_p10 = scmp.lt.u32.totalorder %s1581_s14, %s2108_s7 }
 0x299   :  { %p1587_p11 = pnand %p1585_p10, %p1582_p9 }
 0x29b   :  { %1590 = shalt.err (!%p1587_p11)
}
 0x29c   :  { %1094 = dma.vmem_to_hbm [thread:$0]  %s1089_s8, 2048, %s2108_s7, [#allocation5], %s1603_s1, %s1603_s1, %s1604_s25  }
 0x29d   :  { %1597 = dma.done.wait [#allocation5], 2048  }
 0x29e   :  { %1598 = vsyncadd [#allocation5], 4294965248 }
 0x29f   :  { %1098 = vsyncpa [#allocation4], 1 }
 0x2a0   :  { %1099 = vsyncpa [#allocation7], 1 }
 0x2a1   :  { %1100 = vsyncpa [#allocation10], 1 }
 0x2a2   :  { %1101 = vsyncpa [#allocation5], 1 }

</bundles_post_ra>
